<compile_context>
chip_gen: v7x
topology: tpu7x:2x2x1
jax: 0.10.0
libtpu: 0.0.40
codegen_flags: <defaults>
</compile_context>

<pallas_src>
import math
import functools

import jax
import jax.numpy as jnp
from jax.experimental import pallas as pl
from jax.experimental.pallas import tpu as pltpu


# ----------------------------------------------------------------------------
# Tiling / compiler configuration
# ----------------------------------------------------------------------------

_ROW_TILE = 256                     # preferred row tile for (B*S, D) activations
_VMEM_LIMIT = 48 * 1024 * 1024      # < 64 MiB (v7x physical); safe on v5e/v6e too


def _compiler_params(num_parallel_axes=1):
    return pltpu.CompilerParams(
        dimension_semantics=("parallel",) * num_parallel_axes,
        vmem_limit_bytes=_VMEM_LIMIT,
    )


def _row_grid(m):
    """Return (tile_rows, padded_rows, num_tiles) for row-tiling (M, D)."""
    if m <= _ROW_TILE:
        return m, m, 1            # single full-array block (exempt from 8x128 rule)
    padded = ((m + _ROW_TILE - 1) // _ROW_TILE) * _ROW_TILE
    return _ROW_TILE, padded, padded // _ROW_TILE


def _pad_rows(x2d, padded_m):
    m = x2d.shape[0]
    if padded_m == m:
        return x2d
    return jnp.pad(x2d, ((0, padded_m - m), (0, 0)))


# ----------------------------------------------------------------------------
# In-kernel helpers
# ----------------------------------------------------------------------------

def _mxu(x):
    """Cast MXU operands to bf16 (f32 accumulation is requested at the dot)."""
    return x.astype(jnp.bfloat16)


def _gelu(x):
    # exact GELU (erf), matching torch.nn.GELU default
    return 0.5 * x * (1.0 + jax.lax.erf(x * (1.0 / math.sqrt(2.0))))


def _layernorm(x, g, b, eps):
    mu = jnp.mean(x, axis=-1, keepdims=True)
    var = jnp.mean(jnp.square(x - mu), axis=-1, keepdims=True)
    return (x - mu) * jax.lax.rsqrt(var + eps) * g + b


# ----------------------------------------------------------------------------
# Pallas kernels
# ----------------------------------------------------------------------------

def _linear_kernel(x_ref, w_ref, bias_ref, o_ref, *, activation):
    y = jnp.dot(_mxu(x_ref[...]), _mxu(w_ref[...]),
                preferred_element_type=jnp.float32) + bias_ref[...]
    if activation == "gelu":
        y = _gelu(y)
    o_ref[...] = y.astype(o_ref.dtype)


def _ln_linear_kernel(x_ref, g_ref, b_ref, w_ref, bias_ref, o_ref, *,
                      eps, activation):
    x = x_ref[...].astype(jnp.float32)
    xn = _layernorm(x, g_ref[...], b_ref[...], eps)
    y = jnp.dot(_mxu(xn), _mxu(w_ref[...]),
                preferred_element_type=jnp.float32) + bias_ref[...]
    if activation == "gelu":
        y = _gelu(y)
    o_ref[...] = y.astype(o_ref.dtype)


def _ln_mlp_residual_kernel(x_ref, g_ref, b_ref, w1_ref, b1_ref,
                            w2_ref, b2_ref, o_ref, *, eps):
    # y = x + (gelu(LN(x) @ W1 + b1) @ W2 + b2); the hidden activation never
    # leaves VMEM / vregs.
    x = x_ref[...].astype(jnp.float32)
    xn = _layernorm(x, g_ref[...], b_ref[...], eps)
    h = jnp.dot(_mxu(xn), _mxu(w1_ref[...]),
                preferred_element_type=jnp.float32) + b1_ref[...]
    h = _gelu(h)
    y = jnp.dot(_mxu(h), _mxu(w2_ref[...]),
                preferred_element_type=jnp.float32) + b2_ref[...]
    o_ref[...] = (x + y).astype(o_ref.dtype)


def _attention_kernel(qkv_ref, res_ref, wo_ref, bo_ref, o_ref, *,
                      num_heads, scale):
    # One batch element per grid step: head split, softmax(QK^T)V, out-proj,
    # bias and residual are all fused inside a single kernel.
    qkv = qkv_ref[0].astype(jnp.float32)          # (S, 3D)
    res = res_ref[0].astype(jnp.float32)          # (S, D)
    wo = wo_ref[...]                              # (D, D)
    d = res.shape[-1]
    dh = d // num_heads

    acc = res + bo_ref[...]                       # residual + out-proj bias
    for h in range(num_heads):                    # static unroll over heads
        q = qkv[:, h * dh:(h + 1) * dh]
        k = qkv[:, d + h * dh:d + (h + 1) * dh]
        v = qkv[:, 2 * d + h * dh:2 * d + (h + 1) * dh]

        s = jax.lax.dot_general(_mxu(q), _mxu(k),
                                (((1,), (1,)), ((), ())),
                                preferred_element_type=jnp.float32) * scale
        s = s - jnp.max(s, axis=-1, keepdims=True)
        p = jnp.exp(s)
        p = p * pl.reciprocal(jnp.sum(p, axis=-1, keepdims=True), approx=True)

        o_h = jnp.dot(_mxu(p), _mxu(v), preferred_element_type=jnp.float32)
        # concat(heads) @ Wo  ==  sum_h  o_h @ Wo[h*dh:(h+1)*dh, :]
        acc = acc + jnp.dot(_mxu(o_h), _mxu(wo[h * dh:(h + 1) * dh, :]),
                            preferred_element_type=jnp.float32)

    o_ref[0] = acc.astype(o_ref.dtype)


# ----------------------------------------------------------------------------
# Wrappers (pallas_call plumbing)
# ----------------------------------------------------------------------------

def pallas_linear(x2d, w, b, activation=None):
    """y = act(x2d @ w + b).  x2d: (M, Din), w: (Din, Dout), b: (Dout,)."""
    m, din = x2d.shape
    dout = w.shape[1]
    tm, mp, gm = _row_grid(m)
    xp = _pad_rows(x2d, mp)
    out = pl.pallas_call(
        functools.partial(_linear_kernel, activation=activation),
        out_shape=jax.ShapeDtypeStruct((mp, dout), jnp.float32),
        grid=(gm,),
        in_specs=[
            pl.BlockSpec((tm, din), lambda i: (i, 0)),
            pl.BlockSpec((din, dout), lambda i: (0, 0)),
            pl.BlockSpec((1, dout), lambda i: (0, 0)),
        ],
        out_specs=pl.BlockSpec((tm, dout), lambda i: (i, 0)),
        compiler_params=_compiler_params(),
    )(xp, w, b.reshape(1, dout))
    return out[:m] if mp != m else out


def pallas_ln_linear(x2d, gamma, beta, w, b, activation=None, eps=1e-5):
    """y = act(LN(x2d) @ w + b)."""
    m, din = x2d.shape
    dout = w.shape[1]
    tm, mp, gm = _row_grid(m)
    xp = _pad_rows(x2d, mp)
    out = pl.pallas_call(
        functools.partial(_ln_linear_kernel, eps=eps, activation=activation),
        out_shape=jax.ShapeDtypeStruct((mp, dout), jnp.float32),
        grid=(gm,),
        in_specs=[
            pl.BlockSpec((tm, din), lambda i: (i, 0)),
            pl.BlockSpec((1, din), lambda i: (0, 0)),
            pl.BlockSpec((1, din), lambda i: (0, 0)),
            pl.BlockSpec((din, dout), lambda i: (0, 0)),
            pl.BlockSpec((1, dout), lambda i: (0, 0)),
        ],
        out_specs=pl.BlockSpec((tm, dout), lambda i: (i, 0)),
        compiler_params=_compiler_params(),
    )(xp, gamma.reshape(1, din), beta.reshape(1, din), w, b.reshape(1, dout))
    return out[:m] if mp != m else out


def pallas_ln_mlp_residual(x2d, gamma, beta, w1, b1, w2, b2, eps=1e-5):
    """y = x2d + (gelu(LN(x2d) @ w1 + b1) @ w2 + b2)."""
    m, d = x2d.shape
    hidden = w1.shape[1]
    tm, mp, gm = _row_grid(m)
    xp = _pad_rows(x2d, mp)
    out = pl.pallas_call(
        functools.partial(_ln_mlp_residual_kernel, eps=eps),
        out_shape=jax.ShapeDtypeStruct((mp, d), jnp.float32),
        grid=(gm,),
        in_specs=[
            pl.BlockSpec((tm, d), lambda i: (i, 0)),
            pl.BlockSpec((1, d), lambda i: (0, 0)),
            pl.BlockSpec((1, d), lambda i: (0, 0)),
            pl.BlockSpec((d, hidden), lambda i: (0, 0)),
            pl.BlockSpec((1, hidden), lambda i: (0, 0)),
            pl.BlockSpec((hidden, d), lambda i: (0, 0)),
            pl.BlockSpec((1, d), lambda i: (0, 0)),
        ],
        out_specs=pl.BlockSpec((tm, d), lambda i: (i, 0)),
        compiler_params=_compiler_params(),
    )(xp, gamma.reshape(1, d), beta.reshape(1, d),
      w1, b1.reshape(1, hidden), w2, b2.reshape(1, d))
    return out[:m] if mp != m else out


def pallas_attention(qkv, x_res, wo, bo, num_heads):
    """Fused MHSA + out-proj + residual.

    qkv: (B, S, 3D) packed [Q | K | V], x_res: (B, S, D), wo: (D, D), bo: (D,).
    Returns x_res + MHSA(qkv) @ wo + bo, shape (B, S, D).
    """
    bsz, s, d = x_res.shape
    dh = d // num_heads
    scale = 1.0 / math.sqrt(dh)
    kernel = functools.partial(_attention_kernel, num_heads=num_heads,
                               scale=scale)
    return pl.pallas_call(
        kernel,
        out_shape=jax.ShapeDtypeStruct((bsz, s, d), jnp.float32),
        grid=(bsz,),
        in_specs=[
            pl.BlockSpec((1, s, 3 * d), lambda b: (b, 0, 0)),
            pl.BlockSpec((1, s, d), lambda b: (b, 0, 0)),
            pl.BlockSpec((d, d), lambda b: (0, 0)),
            pl.BlockSpec((1, d), lambda b: (0, 0)),
        ],
        out_specs=pl.BlockSpec((1, s, d), lambda b: (b, 0, 0)),
        compiler_params=_compiler_params(),
    )(qkv, x_res, wo, bo.reshape(1, d))


# ----------------------------------------------------------------------------
# JAX glue: patching, transformer block, full ViT forward
# ----------------------------------------------------------------------------

def image_to_patches(x, patch_size):
    """NCHW image -> (B, T, C*p*p) patches, matching the PyTorch helper."""
    b, c, hgt, wid = x.shape
    p = patch_size
    x = x.reshape(b, c, hgt // p, p, wid // p, p)
    x = x.transpose(0, 2, 4, 1, 3, 5)                 # B, H', W', C, p, p
    return x.reshape(b, (hgt // p) * (wid // p), c * p * p)


def attention_block(x, lp, num_heads):
    """One pre-LN transformer block.  x: (B, S, D)."""
    bsz, s, d = x.shape
    x2 = x.reshape(bsz * s, d)

    # fused LN1 + QKV projection
    qkv = pallas_ln_linear(x2, lp["ln1_g"], lp["ln1_b"],
                           lp["in_proj_w"], lp["in_proj_b"])       # (B*S, 3D)

    # fused head-split + attention + out_proj + bias + residual
    x = pallas_attention(qkv.reshape(bsz, s, 3 * d), x,
                         lp["out_proj_w"], lp["out_proj_b"], num_heads)

    # fused LN2 + MLP (GELU) + residual
    x2 = pallas_ln_mlp_residual(x.reshape(bsz * s, d),
                                lp["ln2_g"], lp["ln2_b"],
                                lp["mlp_w1"], lp["mlp_b1"],
                                lp["mlp_w2"], lp["mlp_b2"])
    return x2.reshape(bsz, s, d)


def vit_forward(x, params, *, patch_size, num_heads):
    patches = image_to_patches(x, patch_size)          # (B, T, C*p*p)
    bsz, t, din = patches.shape
    d = params["input_w"].shape[1]

    h = pallas_linear(patches.reshape(bsz * t, din),
                      params["input_w"], params["input_b"]).reshape(bsz, t, d)

    cls = jnp.broadcast_to(params["cls_token"], (bsz, 1, d))
    h = jnp.concatenate([cls, h], axis=1)              # (B, T+1, D)
    h = h + params["pos_embedding"][:, :t + 1]
    # dropout: identity at inference

    for lp in params["layers"]:
        h = attention_block(h, lp, num_heads)

    cls_out = h[:, 0]                                  # (B, D)  (== seq-first x[0])
    return pallas_ln_linear(cls_out, params["head_ln_g"], params["head_ln_b"],
                            params["head_w"], params["head_b"])


# ----------------------------------------------------------------------------
# Deterministic parameter initialization (synthetic, no checkpoints)
# ----------------------------------------------------------------------------

def init_params(key, *, num_channels, patch_size, embedding_dim, hidden_dim,
                num_layers, num_classes, num_patches,
                weight_dtype=jnp.bfloat16):
    d = embedding_dim
    in_dim = num_channels * patch_size ** 2

    def nxt(k):
        k, sub = jax.random.split(k)
        return k, sub

    def dense(k, din, dout, scale=0.02):
        # matmul weights stored in bf16 (halves weight HBM traffic; MXU inputs
        # are bf16 anyway).  Biases / LN params / embeddings stay f32.
        k, kw = nxt(k)
        w = (jax.random.normal(kw, (din, dout), jnp.float32) * scale)
        return k, w.astype(weight_dtype), jnp.zeros((dout,), jnp.float32)

    params = {}
    key, params["input_w"], params["input_b"] = dense(key, in_dim, d)

    key, kc = nxt(key)
    params["cls_token"] = jax.random.normal(kc, (1, 1, d), jnp.float32)
    key, kp = nxt(key)
    params["pos_embedding"] = jax.random.normal(
        kp, (1, 1 + num_patches, d), jnp.float32)

    layers = []
    for _ in range(num_layers):
        lp = {}
        lp["ln1_g"] = jnp.ones((d,), jnp.float32)
        lp["ln1_b"] = jnp.zeros((d,), jnp.float32)
        key, lp["in_proj_w"], lp["in_proj_b"] = dense(key, d, 3 * d)
        key, lp["out_proj_w"], lp["out_proj_b"] = dense(key, d, d)
        lp["ln2_g"] = jnp.ones((d,), jnp.float32)
        lp["ln2_b"] = jnp.zeros((d,), jnp.float32)
        key, lp["mlp_w1"], lp["mlp_b1"] = dense(key, d, hidden_dim)
        key, lp["mlp_w2"], lp["mlp_b2"] = dense(key, hidden_dim, d)
        layers.append(lp)
    params["layers"] = layers

    params["head_ln_g"] = jnp.ones((d,), jnp.float32)
    params["head_ln_b"] = jnp.zeros((d,), jnp.float32)
    key, params["head_w"], params["head_b"] = dense(key, d, num_classes)
    return params


# ----------------------------------------------------------------------------
# Main
# ----------------------------------------------------------------------------

if __name__ == "__main__":
    # Small config consistent with the module's constructor
    batch = 2
    num_channels = 4
    spatial = 16
    patch_size = 4
    num_patches = (spatial // patch_size) ** 2   # 16
    embedding_dim = 32
    hidden_dim = 64
    num_heads = 4
    num_layers = 2
    num_classes = 10

    key = jax.random.PRNGKey(0)
    key, kx = jax.random.split(key)
    x = jax.random.normal(kx, (batch, num_channels, spatial, spatial),
                          jnp.float32)

    params = init_params(
        key,
        num_channels=num_channels,
        patch_size=patch_size,
        embedding_dim=embedding_dim,
        hidden_dim=hidden_dim,
        num_layers=num_layers,
        num_classes=num_classes,
        num_patches=num_patches,
    )

    fwd = jax.jit(functools.partial(vit_forward, patch_size=patch_size,
                                    num_heads=num_heads))
    out = jax.block_until_ready(fwd(x, params))
    assert out.shape == (batch, num_classes), out.shape
    print("KERNEL_OK")
</pallas_src>

<mosaic_0001>
module attributes {stable_mosaic.version = 11 : i64} {
  func.func @_linear_kernel(%arg0: i32, %arg1: memref<32x64xf32, #tpu.memory_space<vmem>>, %arg2: memref<64x32xbf16, #tpu.memory_space<vmem>>, %arg3: memref<1x32xf32, #tpu.memory_space<vmem>>, %arg4: memref<32x32xf32, #tpu.memory_space<vmem>>) attributes {dimension_semantics = [#tpu.dimension_semantics<parallel>], iteration_bounds = array<i64: 1>, scalar_prefetch = 0 : i64, scratch_operands = 0 : i64, tpu.core_type = #tpu.core_type<tc>, window_params = [{transform_indices = @transform_0, window_bounds = array<i64: 32, 64>}, {pipeline_mode = #tpu.pipeline_mode<synchronous>, transform_indices = @transform_1, window_bounds = array<i64: 64, 32>}, {pipeline_mode = #tpu.pipeline_mode<synchronous>, transform_indices = @transform_2, window_bounds = array<i64: 1, 32>}, {transform_indices = @transform_3, window_bounds = array<i64: 32, 32>}]} {
    %c0 = arith.constant 0 : index
    %c0_0 = arith.constant 0 : index
    %0 = vector.load %arg1[%c0, %c0_0] : memref<32x64xf32, #tpu.memory_space<vmem>>, vector<32x64xf32>
    %1 = arith.truncf %0 : vector<32x64xf32> to vector<32x64xbf16>
    %c0_1 = arith.constant 0 : index
    %c0_2 = arith.constant 0 : index
    %2 = vector.load %arg2[%c0_1, %c0_2] : memref<64x32xbf16, #tpu.memory_space<vmem>>, vector<64x32xbf16>
    %cst = arith.constant dense<0.000000e+00> : vector<32x32xf32>
    %3 = tpu.matmul %1, %2, %cst {dimension_numbers = #tpu.dot_dimension_numbers<[1], [0], [0], [1], [0, 0, 1, 1], [], []>} : vector<32x64xbf16>, vector<64x32xbf16>, vector<32x32xf32> -> vector<32x32xf32>
    %c0_3 = arith.constant 0 : index
    %c0_4 = arith.constant 0 : index
    %4 = vector.load %arg3[%c0_3, %c0_4] : memref<1x32xf32, #tpu.memory_space<vmem>>, vector<1x32xf32>
    %5 = vector.broadcast %4 : vector<1x32xf32> to vector<32x32xf32>
    %6 = arith.addf %3, %5 : vector<32x32xf32>
    %c0_5 = arith.constant 0 : index
    %c0_6 = arith.constant 0 : index
    %7 = vector.load %arg4[%c0_5, %c0_6] : memref<32x32xf32, #tpu.memory_space<vmem>>, vector<32x32xf32>
    tpu.vector_store %arg4[%c0_5, %c0_6], %6 {strides = array<i32>} : memref<32x32xf32, #tpu.memory_space<vmem>>, vector<32x32xf32>,
    return
  }
  func.func @transform_0(%arg0: i32) -> (i32, i32) {
    %c0_i32 = arith.constant 0 : i32
    %c0_i32_0 = arith.constant 0 : i32
    return %arg0, %c0_i32 : i32, i32
  }
  func.func @transform_1(%arg0: i32) -> (i32, i32) {
    %c0_i32 = arith.constant 0 : i32
    %c0_i32_0 = arith.constant 0 : i32
    %c0_i32_1 = arith.constant 0 : i32
    return %c0_i32, %c0_i32_0 : i32, i32
  }
  func.func @transform_2(%arg0: i32) -> (i32, i32) {
    %c0_i32 = arith.constant 0 : i32
    %c0_i32_0 = arith.constant 0 : i32
    %c0_i32_1 = arith.constant 0 : i32
    return %c0_i32, %c0_i32_0 : i32, i32
  }
  func.func @transform_3(%arg0: i32) -> (i32, i32) {
    %c0_i32 = arith.constant 0 : i32
    %c0_i32_0 = arith.constant 0 : i32
    return %arg0, %c0_i32 : i32, i32
  }
}

module attributes {stable_mosaic.version = 11 : i64} {
  func.func @_attention_kernel(%arg0: i32, %arg1: memref<1x17x96xf32, #tpu.memory_space<vmem>>, %arg2: memref<1x17x32xf32, #tpu.memory_space<vmem>>, %arg3: memref<32x32xbf16, #tpu.memory_space<vmem>>, %arg4: memref<1x32xf32, #tpu.memory_space<vmem>>, %arg5: memref<1x17x32xf32, #tpu.memory_space<vmem>>) attributes {dimension_semantics = [#tpu.dimension_semantics<parallel>], iteration_bounds = array<i64: 2>, scalar_prefetch = 0 : i64, scratch_operands = 0 : i64, tpu.core_type = #tpu.core_type<tc>, window_params = [{transform_indices = @transform_0, window_bounds = array<i64: 1, 17, 96>}, {transform_indices = @transform_1, window_bounds = array<i64: 1, 17, 32>}, {pipeline_mode = #tpu.pipeline_mode<synchronous>, transform_indices = @transform_2, window_bounds = array<i64: 32, 32>}, {pipeline_mode = #tpu.pipeline_mode<synchronous>, transform_indices = @transform_3, window_bounds = array<i64: 1, 32>}, {transform_indices = @transform_4, window_bounds = array<i64: 1, 17, 32>}]} {
    %c0 = arith.constant 0 : index
    %c0_0 = arith.constant 0 : index
    %c0_1 = arith.constant 0 : index
    %0 = vector.load %arg1[%c0, %c0_0, %c0_1] : memref<1x17x96xf32, #tpu.memory_space<vmem>>, vector<1x17x96xf32>
    %1 = vector.shape_cast %0 : vector<1x17x96xf32> to vector<17x96xf32>
    %c0_2 = arith.constant 0 : index
    %c0_3 = arith.constant 0 : index
    %c0_4 = arith.constant 0 : index
    %2 = vector.load %arg2[%c0_2, %c0_3, %c0_4] : memref<1x17x32xf32, #tpu.memory_space<vmem>>, vector<1x17x32xf32>
    %3 = vector.shape_cast %2 : vector<1x17x32xf32> to vector<17x32xf32>
    %c0_5 = arith.constant 0 : index
    %c0_6 = arith.constant 0 : index
    %4 = vector.load %arg3[%c0_5, %c0_6] : memref<32x32xbf16, #tpu.memory_space<vmem>>, vector<32x32xbf16>
    %c0_7 = arith.constant 0 : index
    %c0_8 = arith.constant 0 : index
    %5 = vector.load %arg4[%c0_7, %c0_8] : memref<1x32xf32, #tpu.memory_space<vmem>>, vector<1x32xf32>
    %6 = vector.broadcast %5 : vector<1x32xf32> to vector<17x32xf32>
    %7 = arith.addf %3, %6 : vector<17x32xf32>
    %8 = vector.extract_strided_slice %1 {offsets = [0, 0], sizes = [17, 8], strides = [1, 1]} : vector<17x96xf32> to vector<17x8xf32>
    %9 = vector.extract_strided_slice %1 {offsets = [0, 32], sizes = [17, 8], strides = [1, 1]} : vector<17x96xf32> to vector<17x8xf32>
    %10 = vector.extract_strided_slice %1 {offsets = [0, 64], sizes = [17, 8], strides = [1, 1]} : vector<17x96xf32> to vector<17x8xf32>
    %11 = arith.truncf %8 : vector<17x8xf32> to vector<17x8xbf16>
    %12 = arith.truncf %9 : vector<17x8xf32> to vector<17x8xbf16>
    %cst = arith.constant dense<0.000000e+00> : vector<17x17xf32>
    %13 = tpu.matmul %11, %12, %cst {dimension_numbers = #tpu.dot_dimension_numbers<[1], [1], [0], [0], [0, 0, 1, 0], [], []>} : vector<17x8xbf16>, vector<17x8xbf16>, vector<17x17xf32> -> vector<17x17xf32>
    %cst_9 = arith.constant 0.353553385 : f32
    %14 = vector.broadcast %cst_9 : f32 to vector<17x17xf32>
    %15 = arith.mulf %13, %14 : vector<17x17xf32>
    %cst_10 = arith.constant dense<0xFF800000> : vector<17xf32>
    %16 = vector.multi_reduction <maximumf>, %15, %cst_10 [1] : vector<17x17xf32> to vector<17xf32>
    %17 = vector.shape_cast %16 : vector<17xf32> to vector<17x1xf32>
    %18 = vector.broadcast %17 : vector<17x1xf32> to vector<17x17xf32>
    %19 = arith.subf %15, %18 : vector<17x17xf32>
    %20 = math.exp %19 : vector<17x17xf32>
    %cst_11 = arith.constant dense<0.000000e+00> : vector<17xf32>
    %21 = vector.multi_reduction <add>, %20, %cst_11 [1] : vector<17x17xf32> to vector<17xf32>
    %22 = vector.shape_cast %21 : vector<17xf32> to vector<17x1xf32>
    %23 = tpu.reciprocal %22 {approx = true} : vector<17x1xf32> -> vector<17x1xf32>
    %24 = vector.broadcast %23 : vector<17x1xf32> to vector<17x17xf32>
    %25 = arith.mulf %20, %24 : vector<17x17xf32>
    %26 = arith.truncf %25 : vector<17x17xf32> to vector<17x17xbf16>
    %27 = arith.truncf %10 : vector<17x8xf32> to vector<17x8xbf16>
    %cst_12 = arith.constant dense<0.000000e+00> : vector<17x8xf32>
    %28 = tpu.matmul %26, %27, %cst_12 {dimension_numbers = #tpu.dot_dimension_numbers<[1], [0], [0], [1], [0, 0, 1, 1], [], []>} : vector<17x17xbf16>, vector<17x8xbf16>, vector<17x8xf32> -> vector<17x8xf32>
    %29 = arith.truncf %28 : vector<17x8xf32> to vector<17x8xbf16>
    %30 = vector.extract_strided_slice %4 {offsets = [0, 0], sizes = [8, 32], strides = [1, 1]} : vector<32x32xbf16> to vector<8x32xbf16>
    %cst_13 = arith.constant dense<0.000000e+00> : vector<17x32xf32>
    %31 = tpu.matmul %29, %30, %cst_13 {dimension_numbers = #tpu.dot_dimension_numbers<[1], [0], [0], [1], [0, 0, 1, 1], [], []>} : vector<17x8xbf16>, vector<8x32xbf16>, vector<17x32xf32> -> vector<17x32xf32>
    %32 = arith.addf %7, %31 : vector<17x32xf32>
    %33 = vector.extract_strided_slice %1 {offsets = [0, 8], sizes = [17, 8], strides = [1, 1]} : vector<17x96xf32> to vector<17x8xf32>
    %34 = vector.extract_strided_slice %1 {offsets = [0, 40], sizes = [17, 8], strides = [1, 1]} : vector<17x96xf32> to vector<17x8xf32>
    %35 = vector.extract_strided_slice %1 {offsets = [0, 72], sizes = [17, 8], strides = [1, 1]} : vector<17x96xf32> to vector<17x8xf32>
    %36 = arith.truncf %33 : vector<17x8xf32> to vector<17x8xbf16>
    %37 = arith.truncf %34 : vector<17x8xf32> to vector<17x8xbf16>
    %cst_14 = arith.constant dense<0.000000e+00> : vector<17x17xf32>
    %38 = tpu.matmul %36, %37, %cst_14 {dimension_numbers = #tpu.dot_dimension_numbers<[1], [1], [0], [0], [0, 0, 1, 0], [], []>} : vector<17x8xbf16>, vector<17x8xbf16>, vector<17x17xf32> -> vector<17x17xf32>
    %cst_15 = arith.constant 0.353553385 : f32
    %39 = vector.broadcast %cst_15 : f32 to vector<17x17xf32>
    %40 = arith.mulf %38, %39 : vector<17x17xf32>
    %cst_16 = arith.constant dense<0xFF800000> : vector<17xf32>
    %41 = vector.multi_reduction <maximumf>, %40, %cst_16 [1] : vector<17x17xf32> to vector<17xf32>
    %42 = vector.shape_cast %41 : vector<17xf32> to vector<17x1xf32>
    %43 = vector.broadcast %42 : vector<17x1xf32> to vector<17x17xf32>
    %44 = arith.subf %40, %43 : vector<17x17xf32>
    %45 = math.exp %44 : vector<17x17xf32>
    %cst_17 = arith.constant dense<0.000000e+00> : vector<17xf32>
    %46 = vector.multi_reduction <add>, %45, %cst_17 [1] : vector<17x17xf32> to vector<17xf32>
    %47 = vector.shape_cast %46 : vector<17xf32> to vector<17x1xf32>
    %48 = tpu.reciprocal %47 {approx = true} : vector<17x1xf32> -> vector<17x1xf32>
    %49 = vector.broadcast %48 : vector<17x1xf32> to vector<17x17xf32>
    %50 = arith.mulf %45, %49 : vector<17x17xf32>
    %51 = arith.truncf %50 : vector<17x17xf32> to vector<17x17xbf16>
    %52 = arith.truncf %35 : vector<17x8xf32> to vector<17x8xbf16>
    %cst_18 = arith.constant dense<0.000000e+00> : vector<17x8xf32>
    %53 = tpu.matmul %51, %52, %cst_18 {dimension_numbers = #tpu.dot_dimension_numbers<[1], [0], [0], [1], [0, 0, 1, 1], [], []>} : vector<17x17xbf16>, vector<17x8xbf16>, vector<17x8xf32> -> vector<17x8xf32>
    %54 = arith.truncf %53 : vector<17x8xf32> to vector<17x8xbf16>
    %55 = vector.extract_strided_slice %4 {offsets = [8, 0], sizes = [8, 32], strides = [1, 1]} : vector<32x32xbf16> to vector<8x32xbf16>
    %cst_19 = arith.constant dense<0.000000e+00> : vector<17x32xf32>
    %56 = tpu.matmul %54, %55, %cst_19 {dimension_numbers = #tpu.dot_dimension_numbers<[1], [0], [0], [1], [0, 0, 1, 1], [], []>} : vector<17x8xbf16>, vector<8x32xbf16>, vector<17x32xf32> -> vector<17x32xf32>
    %57 = arith.addf %32, %56 : vector<17x32xf32>
    %58 = vector.extract_strided_slice %1 {offsets = [0, 16], sizes = [17, 8], strides = [1, 1]} : vector<17x96xf32> to vector<17x8xf32>
    %59 = vector.extract_strided_slice %1 {offsets = [0, 48], sizes = [17, 8], strides = [1, 1]} : vector<17x96xf32> to vector<17x8xf32>
    %60 = vector.extract_strided_slice %1 {offsets = [0, 80], sizes = [17, 8], strides = [1, 1]} : vector<17x96xf32> to vector<17x8xf32>
    %61 = arith.truncf %58 : vector<17x8xf32> to vector<17x8xbf16>
    %62 = arith.truncf %59 : vector<17x8xf32> to vector<17x8xbf16>
    %cst_20 = arith.constant dense<0.000000e+00> : vector<17x17xf32>
    %63 = tpu.matmul %61, %62, %cst_20 {dimension_numbers = #tpu.dot_dimension_numbers<[1], [1], [0], [0], [0, 0, 1, 0], [], []>} : vector<17x8xbf16>, vector<17x8xbf16>, vector<17x17xf32> -> vector<17x17xf32>
    %cst_21 = arith.constant 0.353553385 : f32
    %64 = vector.broadcast %cst_21 : f32 to vector<17x17xf32>
    %65 = arith.mulf %63, %64 : vector<17x17xf32>
    %cst_22 = arith.constant dense<0xFF800000> : vector<17xf32>
    %66 = vector.multi_reduction <maximumf>, %65, %cst_22 [1] : vector<17x17xf32> to vector<17xf32>
    %67 = vector.shape_cast %66 : vector<17xf32> to vector<17x1xf32>
    %68 = vector.broadcast %67 : vector<17x1xf32> to vector<17x17xf32>
    %69 = arith.subf %65, %68 : vector<17x17xf32>
    %70 = math.exp %69 : vector<17x17xf32>
    %cst_23 = arith.constant dense<0.000000e+00> : vector<17xf32>
    %71 = vector.multi_reduction <add>, %70, %cst_23 [1] : vector<17x17xf32> to vector<17xf32>
    %72 = vector.shape_cast %71 : vector<17xf32> to vector<17x1xf32>
    %73 = tpu.reciprocal %72 {approx = true} : vector<17x1xf32> -> vector<17x1xf32>
    %74 = vector.broadcast %73 : vector<17x1xf32> to vector<17x17xf32>
    %75 = arith.mulf %70, %74 : vector<17x17xf32>
    %76 = arith.truncf %75 : vector<17x17xf32> to vector<17x17xbf16>
    %77 = arith.truncf %60 : vector<17x8xf32> to vector<17x8xbf16>
    %cst_24 = arith.constant dense<0.000000e+00> : vector<17x8xf32>
    %78 = tpu.matmul %76, %77, %cst_24 {dimension_numbers = #tpu.dot_dimension_numbers<[1], [0], [0], [1], [0, 0, 1, 1], [], []>} : vector<17x17xbf16>, vector<17x8xbf16>, vector<17x8xf32> -> vector<17x8xf32>
    %79 = arith.truncf %78 : vector<17x8xf32> to vector<17x8xbf16>
    %80 = vector.extract_strided_slice %4 {offsets = [16, 0], sizes = [8, 32], strides = [1, 1]} : vector<32x32xbf16> to vector<8x32xbf16>
    %cst_25 = arith.constant dense<0.000000e+00> : vector<17x32xf32>
    %81 = tpu.matmul %79, %80, %cst_25 {dimension_numbers = #tpu.dot_dimension_numbers<[1], [0], [0], [1], [0, 0, 1, 1], [], []>} : vector<17x8xbf16>, vector<8x32xbf16>, vector<17x32xf32> -> vector<17x32xf32>
    %82 = arith.addf %57, %81 : vector<17x32xf32>
    %83 = vector.extract_strided_slice %1 {offsets = [0, 24], sizes = [17, 8], strides = [1, 1]} : vector<17x96xf32> to vector<17x8xf32>
    %84 = vector.extract_strided_slice %1 {offsets = [0, 56], sizes = [17, 8], strides = [1, 1]} : vector<17x96xf32> to vector<17x8xf32>
    %85 = vector.extract_strided_slice %1 {offsets = [0, 88], sizes = [17, 8], strides = [1, 1]} : vector<17x96xf32> to vector<17x8xf32>
    %86 = arith.truncf %83 : vector<17x8xf32> to vector<17x8xbf16>
    %87 = arith.truncf %84 : vector<17x8xf32> to vector<17x8xbf16>
    %cst_26 = arith.constant dense<0.000000e+00> : vector<17x17xf32>
    %88 = tpu.matmul %86, %87, %cst_26 {dimension_numbers = #tpu.dot_dimension_numbers<[1], [1], [0], [0], [0, 0, 1, 0], [], []>} : vector<17x8xbf16>, vector<17x8xbf16>, vector<17x17xf32> -> vector<17x17xf32>
    %cst_27 = arith.constant 0.353553385 : f32
    %89 = vector.broadcast %cst_27 : f32 to vector<17x17xf32>
    %90 = arith.mulf %88, %89 : vector<17x17xf32>
    %cst_28 = arith.constant dense<0xFF800000> : vector<17xf32>
    %91 = vector.multi_reduction <maximumf>, %90, %cst_28 [1] : vector<17x17xf32> to vector<17xf32>
    %92 = vector.shape_cast %91 : vector<17xf32> to vector<17x1xf32>
    %93 = vector.broadcast %92 : vector<17x1xf32> to vector<17x17xf32>
    %94 = arith.subf %90, %93 : vector<17x17xf32>
    %95 = math.exp %94 : vector<17x17xf32>
    %cst_29 = arith.constant dense<0.000000e+00> : vector<17xf32>
    %96 = vector.multi_reduction <add>, %95, %cst_29 [1] : vector<17x17xf32> to vector<17xf32>
    %97 = vector.shape_cast %96 : vector<17xf32> to vector<17x1xf32>
    %98 = tpu.reciprocal %97 {approx = true} : vector<17x1xf32> -> vector<17x1xf32>
    %99 = vector.broadcast %98 : vector<17x1xf32> to vector<17x17xf32>
    %100 = arith.mulf %95, %99 : vector<17x17xf32>
    %101 = arith.truncf %100 : vector<17x17xf32> to vector<17x17xbf16>
    %102 = arith.truncf %85 : vector<17x8xf32> to vector<17x8xbf16>
    %cst_30 = arith.constant dense<0.000000e+00> : vector<17x8xf32>
    %103 = tpu.matmul %101, %102, %cst_30 {dimension_numbers = #tpu.dot_dimension_numbers<[1], [0], [0], [1], [0, 0, 1, 1], [], []>} : vector<17x17xbf16>, vector<17x8xbf16>, vector<17x8xf32> -> vector<17x8xf32>
    %104 = arith.truncf %103 : vector<17x8xf32> to vector<17x8xbf16>
    %105 = vector.extract_strided_slice %4 {offsets = [24, 0], sizes = [8, 32], strides = [1, 1]} : vector<32x32xbf16> to vector<8x32xbf16>
    %cst_31 = arith.constant dense<0.000000e+00> : vector<17x32xf32>
    %106 = tpu.matmul %104, %105, %cst_31 {dimension_numbers = #tpu.dot_dimension_numbers<[1], [0], [0], [1], [0, 0, 1, 1], [], []>} : vector<17x8xbf16>, vector<8x32xbf16>, vector<17x32xf32> -> vector<17x32xf32>
    %107 = arith.addf %82, %106 : vector<17x32xf32>
    %c0_32 = arith.constant 0 : index
    %c0_33 = arith.constant 0 : index
    %c0_34 = arith.constant 0 : index
    %108 = vector.load %arg5[%c0_32, %c0_33, %c0_34] : memref<1x17x32xf32, #tpu.memory_space<vmem>>, vector<1x17x32xf32>
    %109 = vector.shape_cast %108 : vector<1x17x32xf32> to vector<17x32xf32>
    %110 = vector.shape_cast %107 : vector<17x32xf32> to vector<1x17x32xf32>
    tpu.vector_store %arg5[%c0_32, %c0_33, %c0_34], %110 {strides = array<i32>} : memref<1x17x32xf32, #tpu.memory_space<vmem>>, vector<1x17x32xf32>,
    return
  }
  func.func @transform_0(%arg0: i32) -> (i32, i32, i32) {
    %c0_i32 = arith.constant 0 : i32
    %c0_i32_0 = arith.constant 0 : i32
    %c0_i32_1 = arith.constant 0 : i32
    return %arg0, %c0_i32, %c0_i32_0 : i32, i32, i32
  }
  func.func @transform_1(%arg0: i32) -> (i32, i32, i32) {
    %c0_i32 = arith.constant 0 : i32
    %c0_i32_0 = arith.constant 0 : i32
    %c0_i32_1 = arith.constant 0 : i32
    return %arg0, %c0_i32, %c0_i32_0 : i32, i32, i32
  }
  func.func @transform_2(%arg0: i32) -> (i32, i32) {
    %c0_i32 = arith.constant 0 : i32
    %c0_i32_0 = arith.constant 0 : i32
    %c0_i32_1 = arith.constant 0 : i32
    return %c0_i32, %c0_i32_0 : i32, i32
  }
  func.func @transform_3(%arg0: i32) -> (i32, i32) {
    %c0_i32 = arith.constant 0 : i32
    %c0_i32_0 = arith.constant 0 : i32
    %c0_i32_1 = arith.constant 0 : i32
    return %c0_i32, %c0_i32_0 : i32, i32
  }
  func.func @transform_4(%arg0: i32) -> (i32, i32, i32) {
    %c0_i32 = arith.constant 0 : i32
    %c0_i32_0 = arith.constant 0 : i32
    %c0_i32_1 = arith.constant 0 : i32
    return %arg0, %c0_i32, %c0_i32_0 : i32, i32, i32
  }
}

module attributes {stable_mosaic.version = 11 : i64} {
  func.func @_ln_linear_kernel(%arg0: i32, %arg1: memref<34x32xf32, #tpu.memory_space<vmem>>, %arg2: memref<1x32xf32, #tpu.memory_space<vmem>>, %arg3: memref<1x32xf32, #tpu.memory_space<vmem>>, %arg4: memref<32x96xbf16, #tpu.memory_space<vmem>>, %arg5: memref<1x96xf32, #tpu.memory_space<vmem>>, %arg6: memref<34x96xf32, #tpu.memory_space<vmem>>) attributes {dimension_semantics = [#tpu.dimension_semantics<parallel>], iteration_bounds = array<i64: 1>, scalar_prefetch = 0 : i64, scratch_operands = 0 : i64, tpu.core_type = #tpu.core_type<tc>, window_params = [{transform_indices = @transform_0, window_bounds = array<i64: 34, 32>}, {pipeline_mode = #tpu.pipeline_mode<synchronous>, transform_indices = @transform_1, window_bounds = array<i64: 1, 32>}, {pipeline_mode = #tpu.pipeline_mode<synchronous>, transform_indices = @transform_2, window_bounds = array<i64: 1, 32>}, {pipeline_mode = #tpu.pipeline_mode<synchronous>, transform_indices = @transform_3, window_bounds = array<i64: 32, 96>}, {pipeline_mode = #tpu.pipeline_mode<synchronous>, transform_indices = @transform_4, window_bounds = array<i64: 1, 96>}, {transform_indices = @transform_5, window_bounds = array<i64: 34, 96>}]} {
    %c0 = arith.constant 0 : index
    %c0_0 = arith.constant 0 : index
    %0 = vector.load %arg1[%c0, %c0_0] : memref<34x32xf32, #tpu.memory_space<vmem>>, vector<34x32xf32>
    %c0_1 = arith.constant 0 : index
    %c0_2 = arith.constant 0 : index
    %1 = vector.load %arg2[%c0_1, %c0_2] : memref<1x32xf32, #tpu.memory_space<vmem>>, vector<1x32xf32>
    %c0_3 = arith.constant 0 : index
    %c0_4 = arith.constant 0 : index
    %2 = vector.load %arg3[%c0_3, %c0_4] : memref<1x32xf32, #tpu.memory_space<vmem>>, vector<1x32xf32>
    %cst = arith.constant dense<0.000000e+00> : vector<34xf32>
    %3 = vector.multi_reduction <add>, %0, %cst [1] : vector<34x32xf32> to vector<34xf32>
    %4 = vector.shape_cast %3 : vector<34xf32> to vector<34x1xf32>
    %cst_5 = arith.constant 3.200000e+01 : f32
    %5 = vector.broadcast %cst_5 : f32 to vector<34x1xf32>
    %6 = arith.divf %4, %5 : vector<34x1xf32>
    %7 = vector.broadcast %6 : vector<34x1xf32> to vector<34x32xf32>
    %8 = arith.subf %0, %7 : vector<34x32xf32>
    %9 = arith.mulf %8, %8 : vector<34x32xf32>
    %cst_6 = arith.constant dense<0.000000e+00> : vector<34xf32>
    %10 = vector.multi_reduction <add>, %9, %cst_6 [1] : vector<34x32xf32> to vector<34xf32>
    %11 = vector.shape_cast %10 : vector<34xf32> to vector<34x1xf32>
    %cst_7 = arith.constant 3.200000e+01 : f32
    %12 = vector.broadcast %cst_7 : f32 to vector<34x1xf32>
    %13 = arith.divf %11, %12 : vector<34x1xf32>
    %14 = vector.broadcast %6 : vector<34x1xf32> to vector<34x32xf32>
    %15 = arith.subf %0, %14 : vector<34x32xf32>
    %cst_8 = arith.constant 9.99999974E-6 : f32
    %16 = vector.broadcast %cst_8 : f32 to vector<34x1xf32>
    %17 = arith.addf %13, %16 : vector<34x1xf32>
    %18 = math.rsqrt %17 : vector<34x1xf32>
    %19 = vector.broadcast %18 : vector<34x1xf32> to vector<34x32xf32>
    %20 = arith.mulf %15, %19 : vector<34x32xf32>
    %21 = vector.broadcast %1 : vector<1x32xf32> to vector<34x32xf32>
    %22 = arith.mulf %20, %21 : vector<34x32xf32>
    %23 = vector.broadcast %2 : vector<1x32xf32> to vector<34x32xf32>
    %24 = arith.addf %22, %23 : vector<34x32xf32>
    %25 = arith.truncf %24 : vector<34x32xf32> to vector<34x32xbf16>
    %c0_9 = arith.constant 0 : index
    %c0_10 = arith.constant 0 : index
    %26 = vector.load %arg4[%c0_9, %c0_10] : memref<32x96xbf16, #tpu.memory_space<vmem>>, vector<32x96xbf16>
    %cst_11 = arith.constant dense<0.000000e+00> : vector<34x96xf32>
    %27 = tpu.matmul %25, %26, %cst_11 {dimension_numbers = #tpu.dot_dimension_numbers<[1], [0], [0], [1], [0, 0, 1, 1], [], []>} : vector<34x32xbf16>, vector<32x96xbf16>, vector<34x96xf32> -> vector<34x96xf32>
    %c0_12 = arith.constant 0 : index
    %c0_13 = arith.constant 0 : index
    %28 = vector.load %arg5[%c0_12, %c0_13] : memref<1x96xf32, #tpu.memory_space<vmem>>, vector<1x96xf32>
    %29 = vector.broadcast %28 : vector<1x96xf32> to vector<34x96xf32>
    %30 = arith.addf %27, %29 : vector<34x96xf32>
    %c0_14 = arith.constant 0 : index
    %c0_15 = arith.constant 0 : index
    %31 = vector.load %arg6[%c0_14, %c0_15] : memref<34x96xf32, #tpu.memory_space<vmem>>, vector<34x96xf32>
    tpu.vector_store %arg6[%c0_14, %c0_15], %30 {strides = array<i32>} : memref<34x96xf32, #tpu.memory_space<vmem>>, vector<34x96xf32>,
    return
  }
  func.func @transform_0(%arg0: i32) -> (i32, i32) {
    %c0_i32 = arith.constant 0 : i32
    %c0_i32_0 = arith.constant 0 : i32
    return %arg0, %c0_i32 : i32, i32
  }
  func.func @transform_1(%arg0: i32) -> (i32, i32) {
    %c0_i32 = arith.constant 0 : i32
    %c0_i32_0 = arith.constant 0 : i32
    %c0_i32_1 = arith.constant 0 : i32
    return %c0_i32, %c0_i32_0 : i32, i32
  }
  func.func @transform_2(%arg0: i32) -> (i32, i32) {
    %c0_i32 = arith.constant 0 : i32
    %c0_i32_0 = arith.constant 0 : i32
    %c0_i32_1 = arith.constant 0 : i32
    return %c0_i32, %c0_i32_0 : i32, i32
  }
  func.func @transform_3(%arg0: i32) -> (i32, i32) {
    %c0_i32 = arith.constant 0 : i32
    %c0_i32_0 = arith.constant 0 : i32
    %c0_i32_1 = arith.constant 0 : i32
    return %c0_i32, %c0_i32_0 : i32, i32
  }
  func.func @transform_4(%arg0: i32) -> (i32, i32) {
    %c0_i32 = arith.constant 0 : i32
    %c0_i32_0 = arith.constant 0 : i32
    %c0_i32_1 = arith.constant 0 : i32
    return %c0_i32, %c0_i32_0 : i32, i32
  }
  func.func @transform_5(%arg0: i32) -> (i32, i32) {
    %c0_i32 = arith.constant 0 : i32
    %c0_i32_0 = arith.constant 0 : i32
    return %arg0, %c0_i32 : i32, i32
  }
}

module attributes {stable_mosaic.version = 11 : i64} {
  func.func @_ln_mlp_residual_kernel(%arg0: i32, %arg1: memref<34x32xf32, #tpu.memory_space<vmem>>, %arg2: memref<1x32xf32, #tpu.memory_space<vmem>>, %arg3: memref<1x32xf32, #tpu.memory_space<vmem>>, %arg4: memref<32x64xbf16, #tpu.memory_space<vmem>>, %arg5: memref<1x64xf32, #tpu.memory_space<vmem>>, %arg6: memref<64x32xbf16, #tpu.memory_space<vmem>>, %arg7: memref<1x32xf32, #tpu.memory_space<vmem>>, %arg8: memref<34x32xf32, #tpu.memory_space<vmem>>) attributes {dimension_semantics = [#tpu.dimension_semantics<parallel>], iteration_bounds = array<i64: 1>, scalar_prefetch = 0 : i64, scratch_operands = 0 : i64, tpu.core_type = #tpu.core_type<tc>, window_params = [{transform_indices = @transform_0, window_bounds = array<i64: 34, 32>}, {pipeline_mode = #tpu.pipeline_mode<synchronous>, transform_indices = @transform_1, window_bounds = array<i64: 1, 32>}, {pipeline_mode = #tpu.pipeline_mode<synchronous>, transform_indices = @transform_2, window_bounds = array<i64: 1, 32>}, {pipeline_mode = #tpu.pipeline_mode<synchronous>, transform_indices = @transform_3, window_bounds = array<i64: 32, 64>}, {pipeline_mode = #tpu.pipeline_mode<synchronous>, transform_indices = @transform_4, window_bounds = array<i64: 1, 64>}, {pipeline_mode = #tpu.pipeline_mode<synchronous>, transform_indices = @transform_5, window_bounds = array<i64: 64, 32>}, {pipeline_mode = #tpu.pipeline_mode<synchronous>, transform_indices = @transform_6, window_bounds = array<i64: 1, 32>}, {transform_indices = @transform_7, window_bounds = array<i64: 34, 32>}]} {
    %c0 = arith.constant 0 : index
    %c0_0 = arith.constant 0 : index
    %0 = vector.load %arg1[%c0, %c0_0] : memref<34x32xf32, #tpu.memory_space<vmem>>, vector<34x32xf32>
    %c0_1 = arith.constant 0 : index
    %c0_2 = arith.constant 0 : index
    %1 = vector.load %arg2[%c0_1, %c0_2] : memref<1x32xf32, #tpu.memory_space<vmem>>, vector<1x32xf32>
    %c0_3 = arith.constant 0 : index
    %c0_4 = arith.constant 0 : index
    %2 = vector.load %arg3[%c0_3, %c0_4] : memref<1x32xf32, #tpu.memory_space<vmem>>, vector<1x32xf32>
    %cst = arith.constant dense<0.000000e+00> : vector<34xf32>
    %3 = vector.multi_reduction <add>, %0, %cst [1] : vector<34x32xf32> to vector<34xf32>
    %4 = vector.shape_cast %3 : vector<34xf32> to vector<34x1xf32>
    %cst_5 = arith.constant 3.200000e+01 : f32
    %5 = vector.broadcast %cst_5 : f32 to vector<34x1xf32>
    %6 = arith.divf %4, %5 : vector<34x1xf32>
    %7 = vector.broadcast %6 : vector<34x1xf32> to vector<34x32xf32>
    %8 = arith.subf %0, %7 : vector<34x32xf32>
    %9 = arith.mulf %8, %8 : vector<34x32xf32>
    %cst_6 = arith.constant dense<0.000000e+00> : vector<34xf32>
    %10 = vector.multi_reduction <add>, %9, %cst_6 [1] : vector<34x32xf32> to vector<34xf32>
    %11 = vector.shape_cast %10 : vector<34xf32> to vector<34x1xf32>
    %cst_7 = arith.constant 3.200000e+01 : f32
    %12 = vector.broadcast %cst_7 : f32 to vector<34x1xf32>
    %13 = arith.divf %11, %12 : vector<34x1xf32>
    %14 = vector.broadcast %6 : vector<34x1xf32> to vector<34x32xf32>
    %15 = arith.subf %0, %14 : vector<34x32xf32>
    %cst_8 = arith.constant 9.99999974E-6 : f32
    %16 = vector.broadcast %cst_8 : f32 to vector<34x1xf32>
    %17 = arith.addf %13, %16 : vector<34x1xf32>
    %18 = math.rsqrt %17 : vector<34x1xf32>
    %19 = vector.broadcast %18 : vector<34x1xf32> to vector<34x32xf32>
    %20 = arith.mulf %15, %19 : vector<34x32xf32>
    %21 = vector.broadcast %1 : vector<1x32xf32> to vector<34x32xf32>
    %22 = arith.mulf %20, %21 : vector<34x32xf32>
    %23 = vector.broadcast %2 : vector<1x32xf32> to vector<34x32xf32>
    %24 = arith.addf %22, %23 : vector<34x32xf32>
    %25 = arith.truncf %24 : vector<34x32xf32> to vector<34x32xbf16>
    %c0_9 = arith.constant 0 : index
    %c0_10 = arith.constant 0 : index
    %26 = vector.load %arg4[%c0_9, %c0_10] : memref<32x64xbf16, #tpu.memory_space<vmem>>, vector<32x64xbf16>
    %cst_11 = arith.constant dense<0.000000e+00> : vector<34x64xf32>
    %27 = tpu.matmul %25, %26, %cst_11 {dimension_numbers = #tpu.dot_dimension_numbers<[1], [0], [0], [1], [0, 0, 1, 1], [], []>} : vector<34x32xbf16>, vector<32x64xbf16>, vector<34x64xf32> -> vector<34x64xf32>
    %c0_12 = arith.constant 0 : index
    %c0_13 = arith.constant 0 : index
    %28 = vector.load %arg5[%c0_12, %c0_13] : memref<1x64xf32, #tpu.memory_space<vmem>>, vector<1x64xf32>
    %29 = vector.broadcast %28 : vector<1x64xf32> to vector<34x64xf32>
    %30 = arith.addf %27, %29 : vector<34x64xf32>
    %cst_14 = arith.constant 5.000000e-01 : f32
    %31 = vector.broadcast %cst_14 : f32 to vector<34x64xf32>
    %32 = arith.mulf %31, %30 : vector<34x64xf32>
    %cst_15 = arith.constant 0.707106769 : f32
    %33 = vector.broadcast %cst_15 : f32 to vector<34x64xf32>
    %34 = arith.mulf %30, %33 : vector<34x64xf32>
    %35 = math.erf %34 : vector<34x64xf32>
    %cst_16 = arith.constant 1.000000e+00 : f32
    %36 = vector.broadcast %cst_16 : f32 to vector<34x64xf32>
    %37 = arith.addf %36, %35 : vector<34x64xf32>
    %38 = arith.mulf %32, %37 : vector<34x64xf32>
    %39 = arith.truncf %38 : vector<34x64xf32> to vector<34x64xbf16>
    %c0_17 = arith.constant 0 : index
    %c0_18 = arith.constant 0 : index
    %40 = vector.load %arg6[%c0_17, %c0_18] : memref<64x32xbf16, #tpu.memory_space<vmem>>, vector<64x32xbf16>
    %cst_19 = arith.constant dense<0.000000e+00> : vector<34x32xf32>
    %41 = tpu.matmul %39, %40, %cst_19 {dimension_numbers = #tpu.dot_dimension_numbers<[1], [0], [0], [1], [0, 0, 1, 1], [], []>} : vector<34x64xbf16>, vector<64x32xbf16>, vector<34x32xf32> -> vector<34x32xf32>
    %c0_20 = arith.constant 0 : index
    %c0_21 = arith.constant 0 : index
    %42 = vector.load %arg7[%c0_20, %c0_21] : memref<1x32xf32, #tpu.memory_space<vmem>>, vector<1x32xf32>
    %43 = vector.broadcast %42 : vector<1x32xf32> to vector<34x32xf32>
    %44 = arith.addf %41, %43 : vector<34x32xf32>
    %45 = arith.addf %0, %44 : vector<34x32xf32>
    %c0_22 = arith.constant 0 : index
    %c0_23 = arith.constant 0 : index
    %46 = vector.load %arg8[%c0_22, %c0_23] : memref<34x32xf32, #tpu.memory_space<vmem>>, vector<34x32xf32>
    tpu.vector_store %arg8[%c0_22, %c0_23], %45 {strides = array<i32>} : memref<34x32xf32, #tpu.memory_space<vmem>>, vector<34x32xf32>,
    return
  }
  func.func @transform_0(%arg0: i32) -> (i32, i32) {
    %c0_i32 = arith.constant 0 : i32
    %c0_i32_0 = arith.constant 0 : i32
    return %arg0, %c0_i32 : i32, i32
  }
  func.func @transform_1(%arg0: i32) -> (i32, i32) {
    %c0_i32 = arith.constant 0 : i32
    %c0_i32_0 = arith.constant 0 : i32
    %c0_i32_1 = arith.constant 0 : i32
    return %c0_i32, %c0_i32_0 : i32, i32
  }
  func.func @transform_2(%arg0: i32) -> (i32, i32) {
    %c0_i32 = arith.constant 0 : i32
    %c0_i32_0 = arith.constant 0 : i32
    %c0_i32_1 = arith.constant 0 : i32
    return %c0_i32, %c0_i32_0 : i32, i32
  }
  func.func @transform_3(%arg0: i32) -> (i32, i32) {
    %c0_i32 = arith.constant 0 : i32
    %c0_i32_0 = arith.constant 0 : i32
    %c0_i32_1 = arith.constant 0 : i32
    return %c0_i32, %c0_i32_0 : i32, i32
  }
  func.func @transform_4(%arg0: i32) -> (i32, i32) {
    %c0_i32 = arith.constant 0 : i32
    %c0_i32_0 = arith.constant 0 : i32
    %c0_i32_1 = arith.constant 0 : i32
    return %c0_i32, %c0_i32_0 : i32, i32
  }
  func.func @transform_5(%arg0: i32) -> (i32, i32) {
    %c0_i32 = arith.constant 0 : i32
    %c0_i32_0 = arith.constant 0 : i32
    %c0_i32_1 = arith.constant 0 : i32
    return %c0_i32, %c0_i32_0 : i32, i32
  }
  func.func @transform_6(%arg0: i32) -> (i32, i32) {
    %c0_i32 = arith.constant 0 : i32
    %c0_i32_0 = arith.constant 0 : i32
    %c0_i32_1 = arith.constant 0 : i32
    return %c0_i32, %c0_i32_0 : i32, i32
  }
  func.func @transform_7(%arg0: i32) -> (i32, i32) {
    %c0_i32 = arith.constant 0 : i32
    %c0_i32_0 = arith.constant 0 : i32
    return %arg0, %c0_i32 : i32, i32
  }
}

module attributes {stable_mosaic.version = 11 : i64} {
  func.func @_ln_linear_kernel(%arg0: i32, %arg1: memref<2x32xf32, #tpu.memory_space<vmem>>, %arg2: memref<1x32xf32, #tpu.memory_space<vmem>>, %arg3: memref<1x32xf32, #tpu.memory_space<vmem>>, %arg4: memref<32x10xbf16, #tpu.memory_space<vmem>>, %arg5: memref<1x10xf32, #tpu.memory_space<vmem>>, %arg6: memref<2x10xf32, #tpu.memory_space<vmem>>) attributes {dimension_semantics = [#tpu.dimension_semantics<parallel>], iteration_bounds = array<i64: 1>, scalar_prefetch = 0 : i64, scratch_operands = 0 : i64, tpu.core_type = #tpu.core_type<tc>, window_params = [{transform_indices = @transform_0, window_bounds = array<i64: 2, 32>}, {pipeline_mode = #tpu.pipeline_mode<synchronous>, transform_indices = @transform_1, window_bounds = array<i64: 1, 32>}, {pipeline_mode = #tpu.pipeline_mode<synchronous>, transform_indices = @transform_2, window_bounds = array<i64: 1, 32>}, {pipeline_mode = #tpu.pipeline_mode<synchronous>, transform_indices = @transform_3, window_bounds = array<i64: 32, 10>}, {pipeline_mode = #tpu.pipeline_mode<synchronous>, transform_indices = @transform_4, window_bounds = array<i64: 1, 10>}, {transform_indices = @transform_5, window_bounds = array<i64: 2, 10>}]} {
    %c0 = arith.constant 0 : index
    %c0_0 = arith.constant 0 : index
    %0 = vector.load %arg1[%c0, %c0_0] : memref<2x32xf32, #tpu.memory_space<vmem>>, vector<2x32xf32>
    %c0_1 = arith.constant 0 : index
    %c0_2 = arith.constant 0 : index
    %1 = vector.load %arg2[%c0_1, %c0_2] : memref<1x32xf32, #tpu.memory_space<vmem>>, vector<1x32xf32>
    %c0_3 = arith.constant 0 : index
    %c0_4 = arith.constant 0 : index
    %2 = vector.load %arg3[%c0_3, %c0_4] : memref<1x32xf32, #tpu.memory_space<vmem>>, vector<1x32xf32>
    %cst = arith.constant dense<0.000000e+00> : vector<2xf32>
    %3 = vector.multi_reduction <add>, %0, %cst [1] : vector<2x32xf32> to vector<2xf32>
    %4 = vector.shape_cast %3 : vector<2xf32> to vector<2x1xf32>
    %cst_5 = arith.constant 3.200000e+01 : f32
    %5 = vector.broadcast %cst_5 : f32 to vector<2x1xf32>
    %6 = arith.divf %4, %5 : vector<2x1xf32>
    %7 = vector.broadcast %6 : vector<2x1xf32> to vector<2x32xf32>
    %8 = arith.subf %0, %7 : vector<2x32xf32>
    %9 = arith.mulf %8, %8 : vector<2x32xf32>
    %cst_6 = arith.constant dense<0.000000e+00> : vector<2xf32>
    %10 = vector.multi_reduction <add>, %9, %cst_6 [1] : vector<2x32xf32> to vector<2xf32>
    %11 = vector.shape_cast %10 : vector<2xf32> to vector<2x1xf32>
    %cst_7 = arith.constant 3.200000e+01 : f32
    %12 = vector.broadcast %cst_7 : f32 to vector<2x1xf32>
    %13 = arith.divf %11, %12 : vector<2x1xf32>
    %14 = vector.broadcast %6 : vector<2x1xf32> to vector<2x32xf32>
    %15 = arith.subf %0, %14 : vector<2x32xf32>
    %cst_8 = arith.constant 9.99999974E-6 : f32
    %16 = vector.broadcast %cst_8 : f32 to vector<2x1xf32>
    %17 = arith.addf %13, %16 : vector<2x1xf32>
    %18 = math.rsqrt %17 : vector<2x1xf32>
    %19 = vector.broadcast %18 : vector<2x1xf32> to vector<2x32xf32>
    %20 = arith.mulf %15, %19 : vector<2x32xf32>
    %21 = vector.broadcast %1 : vector<1x32xf32> to vector<2x32xf32>
    %22 = arith.mulf %20, %21 : vector<2x32xf32>
    %23 = vector.broadcast %2 : vector<1x32xf32> to vector<2x32xf32>
    %24 = arith.addf %22, %23 : vector<2x32xf32>
    %25 = arith.truncf %24 : vector<2x32xf32> to vector<2x32xbf16>
    %c0_9 = arith.constant 0 : index
    %c0_10 = arith.constant 0 : index
    %26 = vector.load %arg4[%c0_9, %c0_10] : memref<32x10xbf16, #tpu.memory_space<vmem>>, vector<32x10xbf16>
    %cst_11 = arith.constant dense<0.000000e+00> : vector<2x10xf32>
    %27 = tpu.matmul %25, %26, %cst_11 {dimension_numbers = #tpu.dot_dimension_numbers<[1], [0], [0], [1], [0, 0, 1, 1], [], []>} : vector<2x32xbf16>, vector<32x10xbf16>, vector<2x10xf32> -> vector<2x10xf32>
    %c0_12 = arith.constant 0 : index
    %c0_13 = arith.constant 0 : index
    %28 = vector.load %arg5[%c0_12, %c0_13] : memref<1x10xf32, #tpu.memory_space<vmem>>, vector<1x10xf32>
    %29 = vector.broadcast %28 : vector<1x10xf32> to vector<2x10xf32>
    %30 = arith.addf %27, %29 : vector<2x10xf32>
    %c0_14 = arith.constant 0 : index
    %c0_15 = arith.constant 0 : index
    %31 = vector.load %arg6[%c0_14, %c0_15] : memref<2x10xf32, #tpu.memory_space<vmem>>, vector<2x10xf32>
    tpu.vector_store %arg6[%c0_14, %c0_15], %30 {strides = array<i32>} : memref<2x10xf32, #tpu.memory_space<vmem>>, vector<2x10xf32>,
    return
  }
  func.func @transform_0(%arg0: i32) -> (i32, i32) {
    %c0_i32 = arith.constant 0 : i32
    %c0_i32_0 = arith.constant 0 : i32
    return %arg0, %c0_i32 : i32, i32
  }
  func.func @transform_1(%arg0: i32) -> (i32, i32) {
    %c0_i32 = arith.constant 0 : i32
    %c0_i32_0 = arith.constant 0 : i32
    %c0_i32_1 = arith.constant 0 : i32
    return %c0_i32, %c0_i32_0 : i32, i32
  }
  func.func @transform_2(%arg0: i32) -> (i32, i32) {
    %c0_i32 = arith.constant 0 : i32
    %c0_i32_0 = arith.constant 0 : i32
    %c0_i32_1 = arith.constant 0 : i32
    return %c0_i32, %c0_i32_0 : i32, i32
  }
  func.func @transform_3(%arg0: i32) -> (i32, i32) {
    %c0_i32 = arith.constant 0 : i32
    %c0_i32_0 = arith.constant 0 : i32
    %c0_i32_1 = arith.constant 0 : i32
    return %c0_i32, %c0_i32_0 : i32, i32
  }
  func.func @transform_4(%arg0: i32) -> (i32, i32) {
    %c0_i32 = arith.constant 0 : i32
    %c0_i32_0 = arith.constant 0 : i32
    %c0_i32_1 = arith.constant 0 : i32
    return %c0_i32, %c0_i32_0 : i32, i32
  }
  func.func @transform_5(%arg0: i32) -> (i32, i32) {
    %c0_i32 = arith.constant 0 : i32
    %c0_i32_0 = arith.constant 0 : i32
    return %arg0, %c0_i32 : i32, i32
  }
}

</mosaic_0001>

<bundles_post_ra>
// kernel: vit_forward.8
= control target key start
LH: loop header
LB: loop body
LE: loop exit
PB: predicated region body
PF: predicated region fallthrough
CT: control target
= control target key end

     0   :  { %vm60_vm0 = vcmask 523264   ;;  %vm116_vm1 = vcmask 261120   ;;  %s213_s1 = inlined_call_operand.vmem [shape: bf16[64,32], index: 1, kind: input, shape index: {}]   ;;  %s214_s0 = inlined_call_operand.vmem [shape: f32[32,64], index: 0, kind: input, shape index: {}]   ;;  %s215_s2 = inlined_call_operand.vmem [shape: f32[1,32], index: 2, kind: input, shape index: {}]   ;;  %s216_s3 = inlined_call_operand.vmem [shape: f32[32,32], index: 3, kind: output, shape index: {}]  }
   0x1   :  { %v150_v0 = vld [vmem:[%s213_s1] sm:$0xff]   ;;  %v151_v1 = vld [vmem:[%s213_s1 + $0x8] sm:$0xff]   ;;  %v152_v2 = vld [vmem:[%s213_s1 + $0x10] sm:$0xff]  }
   0x2   :  { %138 = vmatprep.subr.bf16.mxu0 %v150_v0  ;;  %v15_v3 = vld [vmem:[%s214_s0] sm:$0xff]  ;;  %v16_v4 = vld [vmem:[%s214_s0 + $0x8] sm:$0xff]  ;;  %v153_v6 = vld [vmem:[%s213_s1 + $0x18] sm:$0xff]  }
   0x3   :  { %139 = vmatpush3.bf16.msra.mxu0 %v150_v0  ;;  %v19_v5 = vpack.c.bf16 %v16_v4, %v15_v3  ;;  %v17_v7 = vld [vmem:[%s214_s0 + $0x10] sm:$0xff]  ;;  %v18_v8 = vld [vmem:[%s214_s0 + $0x18] sm:$0xff]  ;;  %v125_v10 = vld [vmem:[%s215_s2] ss:$0 sm:$0xff] }
   0x4   :  { %140 = vmatprep.subr.bf16.mxu0 %v151_v1  ;;  %v20_v9 = vpack.c.bf16 %v18_v8, %v17_v7 }
   0x5   :  { %146 = vmatprep.mubr.msk.bf16.mxu0 %vm60_vm0, %v19_v5 }
   0x7   :  { %141 = vmatpush3.bf16.msra.mxu0 %v151_v1 }
   0x8   :  { %142 = vmatprep.subr.bf16.mxu0 %v152_v2 }
   0xb   :  { %143 = vmatpush3.bf16.msra.mxu0 %v152_v2 }
   0xc   :  { %144 = vmatprep.subr.bf16.mxu0 %v153_v6 }
   0xf   :  { %145 = vmatpush3.bf16.msra.mxu0 %v153_v6 }
  0x12   :  { %147 = vmatmul.mubr.msk.bf16.vlgmr.msra.gmra.mrb[0].mxu0 %vm60_vm0, %v20_v9 }
  0xe5   :  { %v148_v11 = vpop.f32.mrb[0].mxu0 }
  0xe6   :  { %v110_v12 = vadd.f32 %v148_v11, %v125_v10  ;;  %v101_v13 = vpop.f32.mrb[1].mxu0 }
  0xe7   :  { %v102_v14 = vadd.f32 %v125_v10, %v101_v13  ;;  %v149_v15 = vpop.f32.mrb[2].mxu0 }
  0xe8   :  { %119 = vst.msk [vmem:[%s216_s3 + $0x10] sm:$0xff] %vm116_vm1, %v110_v12  ;;  %v113_v16 = vadd.f32 %v149_v15, %v125_v10  ;;  %v104_v17 = vpop.f32.mrb[3].mxu0 }
  0xe9   :  { %117 = vst.msk [vmem:[%s216_s3] sm:$0xff] %vm116_vm1, %v102_v14  ;;  %v105_v18 = vadd.f32 %v125_v10, %v104_v17 }
  0xea   :  { %120 = vst.msk [vmem:[%s216_s3 + $0x18] sm:$0xff] %vm116_vm1, %v113_v16 }
  0xeb   :  { %118 = vst.msk [vmem:[%s216_s3 + $0x8] sm:$0xff] %vm116_vm1, %v105_v18 }

// kernel: vit_forward.9
= control target key start
LH: loop header
LB: loop body
LE: loop exit
PB: predicated region body
PF: predicated region fallthrough
CT: control target
= control target key end

     0   :  { %vm28_vm0 = vcmask 261120   ;;  %vm41_vm1 = vcmask 254976   ;;  %v267_v36 = vmov 0.0   ;;  %vm268_vm2 = vmmov 0   ;;  %s379_s0 = inlined_call_operand.vmem [shape: f32[34,32], index: 0, kind: input, shape index: {}]   ;;  %s380_s3 = inlined_call_operand.vmem [shape: bf16[32,96], index: 3, kind: input, shape index: {}]   ;;  %s381_s1 = inlined_call_operand.vmem [shape: f32[1,32], index: 1, kind: input, shape index: {}]   ;;  %s382_s2 = inlined_call_operand.vmem [shape: f32[1,32], index: 2, kind: input, shape index: {}]   ;;  %s383_s4 = inlined_call_operand.vmem [shape: f32[1,96], index: 4, kind: input, shape index: {}]   ;;  %s384_s5 = inlined_call_operand.vmem [shape: f32[34,96], index: 5, kind: output, shape index: {}]  }
   0x1   :  { %v23_v0 = vld [vmem:[%s379_s0 + $0x10] sm:$0xff]  ;;  %v24_v1 = vld [vmem:[%s379_s0 + $0x18] sm:$0xff]  ;;  %v21_v2 = vld [vmem:[%s379_s0] sm:$0xff]  ;;  %249 = vmatprep.subr.bf16.mxu1 %v267_v36  ;;  %233 = vmatprep.subr.bf16.mxu0 %v267_v36  ;;  %vm209_vm3 = vcmask 785408   ;;  %vm214_vm4 = vcmask 779264  }
   0x2   :  { %v35_v3 = vsel %vm28_vm0, %v23_v0, 0.0  ;;  %v29_v4 = vsel %vm28_vm0, %v21_v2, 0.0  ;;  %v22_v5 = vld [vmem:[%s379_s0 + $0x8] sm:$0xff]  ;;  %v38_v6 = vsel %vm28_vm0, %v24_v1, 0.0  ;;  %v25_v8 = vld [vmem:[%s379_s0 + $0x20] sm:$0x3]  ;;  %241 = vmatprep.mubr.msk.bf16.mxu1 %vm268_vm2, %v267_v36  ;;  %237 = vmatprep.mubr.msk.bf16.mxu0 %vm268_vm2, %v267_v36 }
   0x3   :  { %36 = vadd.xlane.f32.xlu0 %v35_v3  ;;  %30 = vadd.xlane.f32.xlu1 %v29_v4  ;;  %v32_v7 = vsel %vm28_vm0, %v22_v5, 0.0  ;;  %v42_v9 = vsel %vm41_vm1, %v25_v8, 0.0  ;;  %v255_v35 = vld [vmem:[%s380_s3] sm:$0xff]   ;;  %v256_v37 = vld [vmem:[%s380_s3 + $0x8] sm:$0xff]  }
   0x4   :  { %251 = vmatpush3.bf16.msra.mxu1 %v255_v35  ;;  %234 = vmatpush3.bf16.msra.mxu0 %v255_v35  ;;  %v220_v55 = vld [vmem:[%s381_s1] ss:$0 sm:$0xff] }
   0x5   :  { %250 = vmatprep.subr.bf16.mxu1 %v267_v36  ;;  %235 = vmatprep.subr.bf16.mxu0 %v267_v36  ;;  %v221_v61 = vld [vmem:[%s382_s2] ss:$0 sm:$0xff] }
   0x7   :  { %39 = vadd.xlane.f32.xlu0 %v38_v6  ;;  %33 = vadd.xlane.f32.xlu1 %v32_v7 }
   0x8   :  { %252 = vmatpush3.bf16.msra.mxu1 %v256_v37  ;;  %236 = vmatpush3.bf16.msra.mxu0 %v256_v37 }
   0xb   :  { %43 = vadd.xlane.f32.xlu0 %v42_v9 }
  0x90   :  { %v37_v10 = vpop.xlane.xlu0 %36  ;;  %v31_v11 = vpop.xlane.xlu1 %30 }
  0x91   :  { %v48_v12 = vmul.f32 0.03125, %v37_v10  ;;  %v46_v13 = vmul.f32 0.03125, %v31_v11 }
  0x93   :  { %v319_v14 = vsub.f32 %v23_v0, %v48_v12  ;;  %v321_v15 = vsub.f32 %v21_v2, %v46_v13 }
  0x94   :  { %v40_v16 = vpop.xlane.xlu0 %39  ;;  %v34_v17 = vpop.xlane.xlu1 %33 }
  0x95   :  { %v49_v18 = vmul.f32 0.03125, %v40_v16  ;;  %v58_v19 = vmul.f32 %v319_v14, %v319_v14  ;;  %v47_v20 = vmul.f32 0.03125, %v34_v17  ;;  %v56_v21 = vmul.f32 %v321_v15, %v321_v15 }
  0x97   :  { %v54_v22 = vsub.f32 %v24_v1, %v49_v18  ;;  %v67_v23 = vsel %vm28_vm0, %v58_v19, 0.0  ;;  %v328_v24 = vsub.f32 %v22_v5, %v47_v20  ;;  %v61_v28 = vsel %vm28_vm0, %v56_v21, 0.0 }
  0x98   :  { %v44_v25 = vpop.xlane.xlu0 %43  ;;  %68 = vadd.xlane.f32.xlu1 %v67_v23 }
  0x99   :  { %v50_v26 = vmul.f32 0.03125, %v44_v25  ;;  %v59_v27 = vmul.f32 %v54_v22, %v54_v22  ;;  %v57_v29 = vmul.f32 %v328_v24, %v328_v24 }
  0x9b   :  { %v55_v30 = vsub.f32 %v25_v8, %v50_v26  ;;  %v70_v31 = vsel %vm28_vm0, %v59_v27, 0.0  ;;  %v64_v33 = vsel %vm28_vm0, %v57_v29, 0.0 }
  0x9c   :  { %71 = vadd.xlane.f32.xlu0 %v70_v31  ;;  %62 = vadd.xlane.f32.xlu1 %v61_v28 }
  0x9d   :  { %v60_v32 = vmul.f32 %v55_v30, %v55_v30 }
  0x9f   :  { %v73_v34 = vsel %vm41_vm1, %v60_v32, 0.0 }
  0xa0   :  { %74 = vadd.xlane.f32.xlu1 %v73_v34  ;;  %65 = vadd.xlane.f32.xlu0 %v64_v33 }
 0x125   :  { %v69_v38 = vpop.xlane.xlu1 %68 }
 0x126   :  { %v78_v39 = vmul.f32 0.03125, %v69_v38 }
 0x128   :  { %v83_v40 = vadd.f32 1e-05, %v78_v39 }
 0x129   :  { %v72_v41 = vpop.xlane.xlu0 %71  ;;  %v63_v42 = vpop.xlane.xlu1 %62 }
 0x12a   :  { %257 = vrsqrt.f32 %v83_v40  ;;  %v79_v43 = vmul.f32 0.03125, %v72_v41  ;;  %v76_v44 = vmul.f32 0.03125, %v63_v42 }
 0x12c   :  { %v84_v45 = vadd.f32 1e-05, %v79_v43  ;;  %v81_v46 = vadd.f32 1e-05, %v76_v44 }
 0x12d   :  { %v66_v47 = vpop.xlane.xlu0 %65  ;;  %v75_v48 = vpop.xlane.xlu1 %74 }
 0x12e   :  { %259 = vrsqrt.f32 %v84_v45  ;;  %v77_v49 = vmul.f32 0.03125, %v66_v47  ;;  %v80_v50 = vmul.f32 0.03125, %v75_v48 }
 0x12f   :  { %261 = vrsqrt.f32 %v81_v46 }
 0x130   :  { %v82_v51 = vadd.f32 1e-05, %v77_v49  ;;  %v85_v52 = vadd.f32 1e-05, %v80_v50 }
 0x132   :  { %263 = vrsqrt.f32 %v82_v51 }
 0x133   :  { %265 = vrsqrt.f32 %v85_v52 }
 0x134   :  { %v258_v53 = vpop.eup %257 }
 0x135   :  { %v93_v54 = vmul.f32 %v258_v53, %v319_v14  ;;  %v222_v14 = vld [vmem:[%s383_s4] ss:$0 sm:$0xff] }
 0x137   :  { %v104_v59 = vmul.f32 %v220_v55, %v93_v54 }
 0x138   :  { %v260_v56 = vpop.eup %259 }
 0x139   :  { %v262_v57 = vpop.eup %261  ;;  %v94_v58 = vmul.f32 %v260_v56, %v54_v22  ;;  %v115_v2 = vadd.f32 %v221_v61, %v104_v59 }
 0x13a   :  { %v91_v60 = vmul.f32 %v262_v57, %v321_v15 }
 0x13b   :  { %v105_v62 = vmul.f32 %v220_v55, %v94_v58 }
 0x13c   :  { %v264_v63 = vpop.eup %263  ;;  %v102_v4 = vmul.f32 %v220_v55, %v91_v60 }
 0x13d   :  { %v266_v0 = vpop.eup %265  ;;  %v92_v1 = vmul.f32 %v264_v63, %v328_v24  ;;  %v116_v3 = vadd.f32 %v221_v61, %v105_v62 }
 0x13e   :  { %v95_v5 = vmul.f32 %v266_v0, %v55_v30  ;;  %v113_v9 = vadd.f32 %v221_v61, %v102_v4 }
 0x13f   :  { %v119_v6 = vpack.c.bf16 %v116_v3, %v115_v2  ;;  %v103_v7 = vmul.f32 %v220_v55, %v92_v1 }
 0x140   :  { %v106_v8 = vmul.f32 %v220_v55, %v95_v5 }
 0x141   :  { %242 = vmatmul.mubr.msk.bf16.vlgmr.msra.gmra.mrb[0].mxu1 %vm28_vm0, %v119_v6  ;;  %v114_v10 = vadd.f32 %v221_v61, %v103_v7 }
 0x142   :  { %245 = vmatprep.mubr.msk.bf16.mxu1 %vm268_vm2, %v267_v36  ;;  %v117_v12 = vadd.f32 %v221_v61, %v106_v8 }
 0x143   :  { %v118_v11 = vpack.c.bf16 %v114_v10, %v113_v9 }
 0x144   :  { %v120_v13 = vpack.c.bf16 %v117_v12, %v117_v12 }
 0x145   :  { %238 = vmatmul.mubr.msk.bf16.vlgmr.msra.gmra.mrb[0].mxu0 %vm28_vm0, %v118_v11 }
 0x149   :  { %246 = vmatmul.mubr.msk.bf16.gmra.mrb[4].mxu1 %vm28_vm0, %v120_v13 }
 0x214   :  { %v195_v15 = vpop.f32.mrb[0].mxu1 }
 0x215   :  { %v196_v16 = vadd.f32 %v222_v14, %v195_v15  ;;  %v243_v17 = vpop.f32.mrb[1].mxu1 }
 0x216   :  { %v198_v18 = vpop.f32.mrb[2].mxu1 }
 0x217   :  { %212 = vst.msk [vmem:[%s384_s5 + $0x10] sm:$0xff] %vm209_vm3, %v196_v16  ;;  %v199_v19 = vadd.f32 %v222_v14, %v198_v18  ;;  %v244_v20 = vpop.f32.mrb[3].mxu1 }
 0x218   :  { %v187_v21 = vpop.f32.mrb[0].mxu0 }
 0x219   :  { %213 = vst.msk [vmem:[%s384_s5 + $0x18] sm:$0xff] %vm209_vm3, %v199_v19  ;;  %v188_v22 = vadd.f32 %v222_v14, %v187_v21  ;;  %v239_v23 = vpop.f32.mrb[1].mxu0 }
 0x21a   :  { %v190_v24 = vpop.f32.mrb[2].mxu0 }
 0x21b   :  { %210 = vst.msk [vmem:[%s384_s5] sm:$0xff] %vm209_vm3, %v188_v22  ;;  %v191_v25 = vadd.f32 %v222_v14, %v190_v24  ;;  %v240_v26 = vpop.f32.mrb[3].mxu0 }
 0x21c   :  { %v203_v27 = vpop.f32.mrb[4].mxu1 }
 0x21d   :  { %211 = vst.msk [vmem:[%s384_s5 + $0x8] sm:$0xff] %vm209_vm3, %v191_v25  ;;  %v204_v28 = vadd.f32 %v222_v14, %v203_v27  ;;  %v247_v29 = vpop.f32.mrb[5].mxu1 }
 0x21e   :  { %v206_v30 = vpop.f32.mrb[6].mxu1 }
 0x21f   :  { %215 = vst.msk [vmem:[%s384_s5 + $0x20] sm:$0x3] %vm214_vm4, %v204_v28  ;;  %v248_v31 = vpop.f32.mrb[7].mxu1 }

// kernel: vit_forward.10
= control target key start
LH: loop header
LB: loop body
LE: loop exit
PB: predicated region body
PF: predicated region fallthrough
CT: control target
= control target key end

     0   :  { %s1546_s15 = smov 0   ;;  %s1700_s0 = inlined_call_operand.vmem [shape: f32[2,17,96], index: 0, kind: input, shape index: {}]   ;;  %s1701_s1 = inlined_call_operand.vmem [shape: f32[2,17,32], index: 1, kind: input, shape index: {}]   ;;  %s1702_s2 = inlined_call_operand.vmem [shape: bf16[32,32], index: 2, kind: input, shape index: {}]   ;;  %s1703_s3 = inlined_call_operand.vmem [shape: f32[1,32], index: 3, kind: input, shape index: {}]   ;;  %s1704_s4 = inlined_call_operand.vmem [shape: f32[2,17,32], index: 4, kind: output, shape index: {}]  }
   0x1 LB: > { %s1238_s16 = sadd.s32 4294967295, %s1507_s15   ;;  %p1242_p0 = scmp.ge.s32.totalorder %s1507_s15, 1  ;;  %s1507_s15 = sphi %s1546_s15, %s14_s15  }
   0x2   : > { %p172_p1 = scmp.lt.s32.totalorder %s1507_s15, 3 }
   0x4   : > { %p173_p2 = pnand %p1242_p0, %p172_p1 }
   0x5   : > { %p203_p3 = scmp.lt.s32.totalorder (!%p173_p2), %s1238_s16, 1  ;;  %vm247_vm0 = vcmask (!%p173_p2), 64512   ;;  %s1509_s21 = smov (!%p173_p2), 96   ;;  %vm311_vm1 = vcmask (!%p173_p2), 138240   ;;  %vm318_vm2 = vcmask (!%p173_p2), 131072   ;;  %vm359_vm3 = vcmask (!%p173_p2), 1040384  }
   0x6   : > { %176 = sbr.rel (%p173_p2) target bundleno = 1895 (0x767), region = 36  ;;  %s1510_s22 = smov (!%p173_p2), 88   ;;  %v1515_v55 = vmov (!%p173_p2), 0   ;;  %vm421_vm4 = vcmask (!%p173_p2), 1043456   ;;  %vm1169_vm5 = vcmask (!%p173_p2), 253952   ;;  %vm1166_vm6 = vcmask (!%p173_p2), 261120  }
   0x7   : > { %s1511_s23 = smov (!%p173_p2), 120   ;;  %s1512_s24 = smov (!%p173_p2), 64   ;;  %v1599_v56 = vsel (!%p173_p2), %vm359_vm3, 65535, %v1515_v55 }
   0x8   : > { %s1513_s25 = smov (!%p173_p2), 80   ;;  %s1514_s26 = smov (!%p173_p2), 112  }
   0x9   : > { %s1516_s27 = smov (!%p173_p2), 56   ;;  %s1517_s30 = smov (!%p173_p2), 72  }
   0xa   : > { %s1518_s5 = smov (!%p173_p2), 104   ;;  %s1519_s8 = smov (!%p173_p2), 48  }
   0xb   : > { %s1520_s9 = smov (!%p173_p2), 40  }
   0xd   : > { %s1706_s16 = smov (!%p203_p3, %s1238_s16), 1 }
   0xe   : > { %s1554_s17 = smul.u32 24, %s1706_s16 }
  0x10   : > { %s207_s20 = scalar_lea.vmem %s1700_s0, %s1554_s17  ;;  %s212_s18 = scalar_lea.vmem %s1701_s1, %s1554_s17 }
  0x11   : > { %v219_v0 = vld [vmem:[%s207_s20] sm:$0xff]  ;;  %v220_v1 = vld [vmem:[%s207_s20 + $0x8] sm:$0xff]  ;;  %v221_v2 = vld [vmem:[%s207_s20 + $0x10] sm:$0x1] }
  0x12   : > { %v1560_v3 = vpack.c.bf16 %v220_v1, %v219_v0  ;;  %v1563_v4 = vpack.c.bf16 %v221_v2, %v221_v2 }
  0x14   : > { %243 = vrot.lane.b32.xlu0 %v1560_v3, %s1509_s21  ;;  %1321 = vmatprep.mubr.msk.bf16.mxu0 %vm247_vm0, %v1560_v3 }
  0x15   : > { %480 = vrot.lane.b32.xlu1 %v1560_v3, %s1510_s22 }
  0x18   : > { %245 = vrot.lane.b32.xlu0 %v1563_v4, %s1509_s21 }
  0x19   : > { %482 = vrot.lane.b32.xlu1 %v1563_v4, %s1510_s22 }
  0x1c   : > { %476 = vrot.lane.b32.xlu0 %v1560_v3, %s1511_s23 }
  0x1d   : > { %478 = vrot.lane.b32.xlu1 %v1563_v4, %s1511_s23  ;;  %s217_s23 = scalar_lea.vmem %s1704_s4, %s1554_s17 }
  0x86   : > { %v244_v5 = vpop.permute.xlu0 %243 }
  0x87   : > { %1420 = vmatprep.subr.msk.bf16.mxu0 %vm247_vm0, %v244_v5  ;;  %v255_v6 = vsel %vm247_vm0, %v244_v5, 0  ;;  %v481_v9 = vpop.permute.xlu1 %480 }
  0x88   : > { %1318 = vmatpush3.bf16.xpose.msra.mxu0 %v255_v6  ;;  %v491_v10 = vsel %vm247_vm0, %v481_v9, 0 }
  0x8a   : > { %v246_v7 = vpop.permute.xlu0 %245 }
  0x8b   : > { %1421 = vmatprep.subr.msk.bf16.mxu0 %vm247_vm0, %v246_v7  ;;  %v258_v8 = vsel %vm247_vm0, %v246_v7, 0  ;;  %v483_v11 = vpop.permute.xlu1 %482 }
  0x8c   : > { %v494_v12 = vsel %vm247_vm0, %v483_v11, 0 }
  0x8e   : > { %v477_v13 = vpop.permute.xlu0 %476 }
  0x8f   : > { %v479_v14 = vpop.permute.xlu1 %478 }
  0x90   : > { %1320 = vmatpush3.bf16.xpose.msra.mxu0 %v258_v8 }
  0x91   : > { %1423 = vmatprep.subr.msk.bf16.mxu0 %vm247_vm0, %v481_v9 }
  0x97   : > { %1322 = vmatmul.mubr.msk.bf16.vlgmr.msra.gmra.mrb[0].mxu0 %vm247_vm0, %v1563_v4 }
  0x98   : > { %1340 = vmatpush3.bf16.xpose.msra.mxu0 %v491_v10  ;;  %1343 = vmatprep.mubr.msk.bf16.mxu0 %vm247_vm0, %v477_v13 }
  0x99   : > { %1424 = vmatprep.subr.msk.bf16.mxu0 %vm247_vm0, %v483_v11 }
  0xa0   : > { %1342 = vmatpush3.bf16.xpose.msra.mxu0 %v494_v12 }
  0xa7   : > { %1344 = vmatmul.mubr.msk.bf16.vlgmr.msra.gmra.mrb[4].mxu0 %vm247_vm0, %v479_v14 }
 0x16a   : > { %v1323_v15 = vpop.f32.mrb[0].mxu0 }
 0x16b   : > { %v294_v16 = vpop.f32.mrb[1].mxu0  ;;  %v310_v20 = vmul.f32 0.35355338, %v1323_v15 }
 0x16c   : > { %v308_v17 = vmul.f32 0.35355338, %v294_v16  ;;  %v1324_v18 = vpop.f32.mrb[2].mxu0 }
 0x16d   : > { %v297_v19 = vpop.f32.mrb[3].mxu0  ;;  %v319_v24 = vsel %vm318_vm2, %v310_v20, -inf }
 0x16e   : > { %v309_v21 = vmul.f32 0.35355338, %v297_v19  ;;  %v312_v22 = vsel %vm311_vm1, %v308_v17, -inf }
 0x16f   : > { %313 = vmax.xlane.f32.xlu0 %v312_v22 }
 0x170   : > { %v315_v23 = vsel %vm311_vm1, %v309_v21, -inf }
 0x171   : > { %316 = vmax.xlane.f32.xlu1 %v315_v23 }
 0x173   : > { %320 = vmax.xlane.f32.xlu0 %v319_v24 }
 0x17a   : > { %v1345_v25 = vpop.f32.mrb[4].mxu0 }
 0x17b   : > { %v530_v26 = vpop.f32.mrb[5].mxu0  ;;  %v546_v47 = vmul.f32 0.35355338, %v1345_v25  ;;  %v225_v25 = vld [vmem:[%s1702_s2] sm:$0xf] }
 0x17c   : > { %v1346_v27 = vpop.f32.mrb[6].mxu0  ;;  %v544_v44 = vmul.f32 0.35355338, %v530_v26  ;;  %v423_v26 = vsel %vm421_vm4, %v225_v25, 0 }
 0x17d   : > { %v533_v28 = vpop.f32.mrb[7].mxu0  ;;  %v553_v49 = vsel %vm318_vm2, %v546_v47, -inf }
 0x17e   : > { %v545_v45 = vmul.f32 0.35355338, %v533_v28  ;;  %v547_v46 = vsel %vm311_vm1, %v544_v44, -inf }
 0x180   : > { %v550_v48 = vsel %vm311_vm1, %v545_v45, -inf }
 0x1fc   : > { %v314_v29 = vpop.xlane.xlu0 %313 }
 0x1fd   : > { %v322_v31 = vsub.f32 %v308_v17, %v314_v29 }
 0x1fe   : > { %v317_v30 = vpop.xlane.xlu1 %316 }
 0x1ff   : > { %v323_v32 = vsub.f32 %v309_v21, %v317_v30  ;;  %v325_v36 = vmul.f32 1.442695, %v322_v31 }
 0x200   : > { %v321_v33 = vpop.xlane.xlu0 %320 }
 0x201   : > { %v327_v34 = vmul.f32 1.442695, %v323_v32  ;;  %v324_v35 = vsub.f32 %v310_v20, %v321_v33 }
 0x203   : > { %1453 = vpow2.f32 %v327_v34  ;;  %v329_v37 = vmul.f32 1.442695, %v324_v35 }
 0x205   : > { %1455 = vpow2.f32 %v329_v37 }
 0x206   : > { %1457 = vpow2.f32 %v325_v36 }
 0x20d   : > { %v1454_v38 = vpop.eup %1453 }
 0x20e   : > { %v334_v39 = vsel %vm311_vm1, %v1454_v38, 0.0 }
 0x20f   : > { %v1456_v40 = vpop.eup %1455  ;;  %335 = vadd.xlane.f32.xlu1 %v334_v39 }
 0x210   : > { %v337_v41 = vsel %vm318_vm2, %v1456_v40, 0.0  ;;  %v1458_v42 = vpop.eup %1457 }
 0x211   : > { %338 = vadd.xlane.f32.xlu0 %v337_v41  ;;  %v331_v43 = vsel %vm311_vm1, %v1458_v42, 0.0 }
 0x215   : > { %332 = vadd.xlane.f32.xlu0 %v331_v43 }
 0x220   : > { %348 = vrot.lane.b32.xlu1 %v1560_v3, %s1512_s24 }
 0x224   : > { %710 = vrot.lane.b32.xlu1 %v1560_v3, %s1513_s25 }
 0x228   : > { %712 = vrot.lane.b32.xlu1 %v1563_v4, %s1513_s25 }
 0x22b   : > { %350 = vrot.lane.b32.xlu0 %v1563_v4, %s1512_s24 }
 0x22c   : > { %708 = vrot.lane.b32.xlu1 %v1563_v4, %s1514_s26 }
 0x22f   : > { %706 = vrot.lane.b32.xlu0 %v1560_v3, %s1514_s26 }
 0x24e   : > { %548 = vmax.xlane.f32.xlu0 %v547_v46 }
 0x250   : > { %551 = vmax.xlane.f32.xlu1 %v550_v48 }
 0x252   : > { %554 = vmax.xlane.f32.xlu0 %v553_v49 }
 0x29c   : > { %v336_v50 = vpop.xlane.xlu1 %335 }
 0x29e   : > { %v339_v51 = vpop.xlane.xlu0 %338 }
 0x29f   : > { %1459 = vrcp.f32 %v339_v51 }
 0x2a0   : > { %v349_v52 = vpop.permute.xlu1 %348  ;;  %1461 = vrcp.f32 %v336_v50 }
 0x2a1   : > { %1325 = vmatprep.subr.bf16.mxu1 %v349_v52 }
 0x2a2   : > { %v333_v53 = vpop.xlane.xlu0 %332  ;;  %1326 = vmatpush3.bf16.msra.mxu1 %v349_v52 }
 0x2a3   : > { %1463 = vrcp.f32 %v333_v53 }
 0x2a4   : > { %v711_v54 = vpop.permute.xlu1 %710 }
 0x2a5   : > { %v721_v57 = vsel %vm247_vm0, %v711_v54, 0  ;;  %1426 = vmatprep.subr.msk.bf16.mxu0 %vm247_vm0, %v711_v54 }
 0x2a6   : > { %1362 = vmatpush3.bf16.xpose.msra.mxu0 %v721_v57  ;;  %v351_v58 = vpop.permute.xlu0 %350 }
 0x2a7   : > { %v363_v59 = vand.u32 %v1599_v56, %v351_v58 }
 0x2a8   : > { %v713_v60 = vpop.permute.xlu1 %712 }
 0x2a9   : > { %1427 = vmatprep.subr.msk.bf16.mxu0 %vm247_vm0, %v713_v60  ;;  %1327 = vmatprep.subr.bf16.mxu1 %v363_v59  ;;  %v1460_v61 = vpop.eup %1459  ;;  %v724_v1 = vsel %vm247_vm0, %v713_v60, 0 }
 0x2aa   : > { %1328 = vmatpush3.bf16.msra.mxu1 %v363_v59  ;;  %v707_v62 = vpop.permute.xlu0 %706  ;;  %v1462_v63 = vpop.eup %1461  ;;  %v345_v2 = vmul.f32 %v1460_v61, %v1456_v40 }
 0x2ab   : > { %1365 = vmatprep.mubr.msk.bf16.mxu0 %vm247_vm0, %v707_v62  ;;  %v344_v6 = vmul.f32 %v1462_v63, %v1454_v38  ;;  %1422 = vmatprep.subr.msk.bf16.mxu1 %vm421_vm4, %v225_v25 }
 0x2ac   : > { %v347_v8 = vpack.c.bf16 %v345_v2, %v345_v2  ;;  %v709_v9 = vpop.permute.xlu1 %708 }
 0x2ad   : > { %v1464_v0 = vpop.eup %1463 }
 0x2ae   : > { %1364 = vmatpush3.bf16.xpose.msra.mxu0 %v724_v1  ;;  %v343_v5 = vmul.f32 %v1464_v0, %v1458_v42  ;;  %v226_v0 = vld [vmem:[%s1702_s2 + $0x4] sm:$0xf] }
 0x2af   : > { %v653_v1 = vsel %vm421_vm4, %v226_v0, 0 }
 0x2b0   : > { %v346_v7 = vpack.c.bf16 %v344_v6, %v343_v5 }
 0x2b2   : > { %1329 = vmatprep.mubr.msk.bf16.mxu1 %vm311_vm1, %v346_v7 }
 0x2b3   : > { %1330 = vmatmul.mubr.msk.bf16.vlgmr.msra.gmra.mrb[0].mxu1 %vm311_vm1, %v347_v8 }
 0x2b4   : > { %1334 = vmatpush3.bf16.msra.mxu1 %v423_v26 }
 0x2b5   : > { %1366 = vmatmul.mubr.msk.bf16.vlgmr.msra.gmra.mrb[8].mxu0 %vm247_vm0, %v709_v9 }
 0x2db   : > { %v549_v10 = vpop.xlane.xlu0 %548 }
 0x2dc   : > { %v556_v12 = vsub.f32 %v544_v44, %v549_v10 }
 0x2dd   : > { %v552_v11 = vpop.xlane.xlu1 %551 }
 0x2de   : > { %v557_v13 = vsub.f32 %v545_v45, %v552_v11  ;;  %v559_v17 = vmul.f32 1.442695, %v556_v12 }
 0x2df   : > { %v555_v14 = vpop.xlane.xlu0 %554 }
 0x2e0   : > { %v561_v15 = vmul.f32 1.442695, %v557_v13  ;;  %v558_v16 = vsub.f32 %v546_v47, %v555_v14 }
 0x2e2   : > { %1465 = vpow2.f32 %v561_v15  ;;  %v563_v18 = vmul.f32 1.442695, %v558_v16 }
 0x2e4   : > { %1467 = vpow2.f32 %v563_v18 }
 0x2e5   : > { %1469 = vpow2.f32 %v559_v17 }
 0x2ec   : > { %v1610_v19 = vpop.eup %1465 }
 0x2ed   : > { %v568_v20 = vsel %vm311_vm1, %v1610_v19, 0.0 }
 0x2ee   : > { %v1614_v21 = vpop.eup %1467  ;;  %569 = vadd.xlane.f32.xlu1 %v568_v20 }
 0x2ef   : > { %v571_v22 = vsel %vm318_vm2, %v1614_v21, 0.0  ;;  %v1470_v23 = vpop.eup %1469 }
 0x2f0   : > { %572 = vadd.xlane.f32.xlu0 %v571_v22  ;;  %v565_v24 = vsel %vm311_vm1, %v1470_v23, 0.0 }
 0x2f4   : > { %566 = vadd.xlane.f32.xlu0 %v565_v24 }
 0x2ff   : > { %582 = vrot.lane.b32.xlu1 %v1560_v3, %s1516_s27 }
 0x303   : > { %940 = vrot.lane.b32.xlu1 %v1560_v3, %s1517_s30 }
 0x307   : > { %942 = vrot.lane.b32.xlu1 %v1563_v4, %s1517_s30 }
 0x30a   : > { %584 = vrot.lane.b32.xlu0 %v1563_v4, %s1516_s27 }
 0x30b   : > { %938 = vrot.lane.b32.xlu1 %v1563_v4, %s1518_s5 }
 0x30e   : > { %936 = vrot.lane.b32.xlu0 %v1560_v3, %s1518_s5 }
 0x37b   : > { %v570_v27 = vpop.xlane.xlu1 %569 }
 0x37c   : > { %1471 = vrcp.f32 %v570_v27 }
 0x37d   : > { %v573_v28 = vpop.xlane.xlu0 %572 }
 0x37e   : > { %1473 = vrcp.f32 %v573_v28 }
 0x37f   : > { %v583_v29 = vpop.permute.xlu1 %582 }
 0x380   : > { %1347 = vmatprep.subr.bf16.mxu1 %v583_v29 }
 0x381   : > { %v567_v30 = vpop.xlane.xlu0 %566 }
 0x382   : > { %1475 = vrcp.f32 %v567_v30 }
 0x383   : > { %v941_v31 = vpop.permute.xlu1 %940 }
 0x384   : > { %v951_v32 = vsel %vm247_vm0, %v941_v31, 0  ;;  %1429 = vmatprep.subr.msk.bf16.mxu0 %vm247_vm0, %v941_v31 }
 0x385   : > { %1384 = vmatpush3.bf16.xpose.msra.mxu0 %v951_v32  ;;  %v585_v33 = vpop.permute.xlu0 %584 }
 0x386   : > { %v1331_v34 = vpop.f32.mrb[0].mxu1  ;;  %v1472_v41 = vpop.eup %1471  ;;  %v594_v50 = vand.u32 %v585_v33, %v1599_v56 }
 0x387   : > { %v399_v35 = vpop.f32.mrb[1].mxu1  ;;  %v943_v36 = vpop.permute.xlu1 %942  ;;  %v414_v47 = vpack.c.bf16 %v1331_v34, %v1331_v34  ;;  %v578_v57 = vmul.f32 %v1472_v41, %v1610_v19 }
 0x388   : > { %v1332_v37 = vpop.f32.mrb[2].mxu1  ;;  %v1367_v38 = vpop.f32.mrb[8].mxu0  ;;  %1430 = vmatprep.subr.msk.bf16.mxu0 %vm247_vm0, %v943_v36  ;;  %v954_v49 = vsel %vm247_vm0, %v943_v36, 0 }
 0x389   : > { %v402_v39 = vpop.f32.mrb[3].mxu1  ;;  %v760_v40 = vpop.f32.mrb[9].mxu0  ;;  %v776_v52 = vmul.f32 0.35355338, %v1367_v38 }
 0x38a   : > { %v413_v42 = vpack.c.bf16 %v402_v39, %v399_v35  ;;  %v774_v43 = vmul.f32 0.35355338, %v760_v40  ;;  %v1368_v44 = vpop.f32.mrb[10].mxu0  ;;  %v937_v45 = vpop.permute.xlu0 %936 }
 0x38b   : > { %v1474_v46 = vpop.eup %1473  ;;  %v763_v48 = vpop.f32.mrb[11].mxu0  ;;  %1387 = vmatprep.mubr.msk.bf16.mxu0 %vm247_vm0, %v937_v45  ;;  %v783_v61 = vsel %vm318_vm2, %v776_v52, -inf }
 0x38c   : > { %v1476_v51 = vpop.eup %1475  ;;  %v775_v53 = vmul.f32 0.35355338, %v763_v48  ;;  %1335 = vmatprep.mubr.msk.bf16.mxu1 %vm247_vm0, %v413_v42  ;;  %v777_v54 = vsel %vm311_vm1, %v774_v43, -inf  ;;  %v579_v59 = vmul.f32 %v1474_v46, %v1614_v21  ;;  %v939_v62 = vpop.permute.xlu1 %938 }
 0x38d   : > { %1336 = vmatmul.mubr.msk.bf16.vlgmr.msra.gmra.mrb[4].mxu1 %vm247_vm0, %v414_v47  ;;  %778 = vmax.xlane.f32.xlu0 %v777_v54  ;;  %v577_v55 = vmul.f32 %v1476_v51, %v1470_v23 }
 0x38e   : > { %1348 = vmatpush3.bf16.msra.mxu1 %v583_v29  ;;  %1386 = vmatpush3.bf16.xpose.msra.mxu0 %v954_v49  ;;  %v780_v58 = vsel %vm311_vm1, %v775_v53, -inf  ;;  %v581_v63 = vpack.c.bf16 %v579_v59, %v579_v59 }
 0x38f   : > { %781 = vmax.xlane.f32.xlu1 %v780_v58  ;;  %1349 = vmatprep.subr.bf16.mxu1 %v594_v50  ;;  %v580_v60 = vpack.c.bf16 %v578_v57, %v577_v55 }
 0x391   : > { %784 = vmax.xlane.f32.xlu0 %v783_v61  ;;  %1351 = vmatprep.mubr.msk.bf16.mxu1 %vm311_vm1, %v580_v60 }
 0x392   : > { %1350 = vmatpush3.bf16.msra.mxu1 %v594_v50 }
 0x393   : > { %1425 = vmatprep.subr.msk.bf16.mxu1 %vm421_vm4, %v226_v0 }
 0x395   : > { %1388 = vmatmul.mubr.msk.bf16.vlgmr.msra.gmra.mrb[12].mxu0 %vm247_vm0, %v939_v62  ;;  %1352 = vmatmul.mubr.msk.bf16.vlgmr.msra.gmra.mrb[8].mxu1 %vm311_vm1, %v581_v63 }
 0x396   : > { %1356 = vmatpush3.bf16.msra.mxu1 %v653_v1  ;;  %v227_v1 = vld [vmem:[%s1702_s2 + $0x8] sm:$0xf] }
 0x41a   : > { %v779_v2 = vpop.xlane.xlu0 %778 }
 0x41b   : > { %v786_v6 = vsub.f32 %v774_v43, %v779_v2  ;;  %v883_v2 = vsel %vm421_vm4, %v227_v1, 0 }
 0x41c   : > { %v782_v5 = vpop.xlane.xlu1 %781 }
 0x41d   : > { %v787_v7 = vsub.f32 %v775_v53, %v782_v5  ;;  %v789_v11 = vmul.f32 1.442695, %v786_v6 }
 0x41e   : > { %v785_v8 = vpop.xlane.xlu0 %784 }
 0x41f   : > { %v791_v9 = vmul.f32 1.442695, %v787_v7  ;;  %v788_v10 = vsub.f32 %v776_v52, %v785_v8 }
 0x421   : > { %1477 = vpow2.f32 %v791_v9  ;;  %v793_v12 = vmul.f32 1.442695, %v788_v10 }
 0x423   : > { %1479 = vpow2.f32 %v793_v12 }
 0x424   : > { %1481 = vpow2.f32 %v789_v11 }
 0x42b   : > { %v1478_v13 = vpop.eup %1477 }
 0x42c   : > { %v798_v14 = vsel %vm311_vm1, %v1478_v13, 0.0 }
 0x42d   : > { %v1480_v15 = vpop.eup %1479  ;;  %799 = vadd.xlane.f32.xlu1 %v798_v14 }
 0x42e   : > { %v801_v16 = vsel %vm318_vm2, %v1480_v15, 0.0  ;;  %v1482_v17 = vpop.eup %1481 }
 0x42f   : > { %802 = vadd.xlane.f32.xlu0 %v801_v16  ;;  %v795_v18 = vsel %vm311_vm1, %v1482_v17, 0.0 }
 0x433   : > { %796 = vadd.xlane.f32.xlu0 %v795_v18 }
 0x43e   : > { %812 = vrot.lane.b32.xlu1 %v1560_v3, %s1519_s8 }
 0x449   : > { %814 = vrot.lane.b32.xlu0 %v1563_v4, %s1519_s8 }
 0x468   : > { %v1389_v19 = vpop.f32.mrb[12].mxu0  ;;  %v1353_v20 = vpop.f32.mrb[8].mxu1 }
 0x469   : > { %v990_v21 = vpop.f32.mrb[13].mxu0  ;;  %v630_v22 = vpop.f32.mrb[9].mxu1  ;;  %v1006_v28 = vmul.f32 0.35355338, %v1389_v19  ;;  %v645_v32 = vpack.c.bf16 %v1353_v20, %v1353_v20 }
 0x46a   : > { %v1004_v23 = vmul.f32 0.35355338, %v990_v21  ;;  %v1390_v24 = vpop.f32.mrb[14].mxu0  ;;  %v1354_v25 = vpop.f32.mrb[10].mxu1 }
 0x46b   : > { %v993_v26 = vpop.f32.mrb[15].mxu0  ;;  %v633_v27 = vpop.f32.mrb[11].mxu1  ;;  %v1013_v34 = vsel %vm318_vm2, %v1006_v28, -inf }
 0x46c   : > { %v1005_v29 = vmul.f32 0.35355338, %v993_v26  ;;  %v644_v30 = vpack.c.bf16 %v633_v27, %v630_v22  ;;  %v1007_v31 = vsel %vm311_vm1, %v1004_v23, -inf  ;;  %v228_v22 = vld [vmem:[%s1702_s2 + $0xc] sm:$0xf] }
 0x46d   : > { %1008 = vmax.xlane.f32.xlu1 %v1007_v31  ;;  %v1246_v31 = vld [vmem:[%s1703_s3] ss:$0 sm:$0xff] }
 0x46e   : > { %1357 = vmatprep.mubr.msk.bf16.mxu1 %vm247_vm0, %v644_v30  ;;  %v1010_v33 = vsel %vm311_vm1, %v1005_v29, -inf  ;;  %v224_v30 = vld [vmem:[%s212_s18 + $0x10] sm:$0x1] }
 0x46f   : > { %1011 = vmax.xlane.f32.xlu0 %v1010_v33  ;;  %1358 = vmatmul.mubr.msk.bf16.vlgmr.msra.gmra.mrb[4].mxu1 %vm247_vm0, %v645_v32  ;;  %v222_v32 = vld [vmem:[%s212_s18] sm:$0xff]  ;;  %v238_v33 = vadd.f32 %v1246_v31, %v224_v30 }
 0x471   : > { %1014 = vmax.xlane.f32.xlu1 %v1013_v34  ;;  %v223_v34 = vld [vmem:[%s212_s18 + $0x8] sm:$0xff] }
 0x4ba   : > { %v800_v35 = vpop.xlane.xlu1 %799 }
 0x4bc   : > { %v803_v36 = vpop.xlane.xlu0 %802 }
 0x4bd   : > { %1483 = vrcp.f32 %v803_v36 }
 0x4be   : > { %v813_v37 = vpop.permute.xlu1 %812  ;;  %1485 = vrcp.f32 %v800_v35  ;;  %v236_v35 = vadd.f32 %v1246_v31, %v222_v32 }
 0x4bf   : > { %1369 = vmatprep.subr.bf16.mxu1 %v813_v37 }
 0x4c0   : > { %v797_v38 = vpop.xlane.xlu0 %796  ;;  %1370 = vmatpush3.bf16.msra.mxu1 %v813_v37  ;;  %v237_v37 = vadd.f32 %v1246_v31, %v223_v34 }
 0x4c1   : > { %1487 = vrcp.f32 %v797_v38 }
 0x4c4   : > { %v815_v39 = vpop.permute.xlu0 %814 }
 0x4c5   : > { %v824_v40 = vand.u32 %v815_v39, %v1599_v56 }
 0x4c7   : > { %1371 = vmatprep.subr.bf16.mxu1 %v824_v40  ;;  %v1484_v41 = vpop.eup %1483 }
 0x4c8   : > { %1372 = vmatpush3.bf16.msra.mxu1 %v824_v40  ;;  %v1486_v42 = vpop.eup %1485  ;;  %v809_v44 = vmul.f32 %v1484_v41, %v1480_v15 }
 0x4c9   : > { %v808_v46 = vmul.f32 %v1486_v42, %v1478_v13  ;;  %1428 = vmatprep.subr.msk.bf16.mxu1 %vm421_vm4, %v227_v1 }
 0x4ca   : > { %v811_v48 = vpack.c.bf16 %v809_v44, %v809_v44 }
 0x4cb   : > { %v1488_v43 = vpop.eup %1487 }
 0x4cc   : > { %v807_v45 = vmul.f32 %v1488_v43, %v1482_v17 }
 0x4ce   : > { %v810_v47 = vpack.c.bf16 %v808_v46, %v807_v45 }
 0x4d0   : > { %1373 = vmatprep.mubr.msk.bf16.mxu1 %vm311_vm1, %v810_v47 }
 0x4d1   : > { %1374 = vmatmul.mubr.msk.bf16.vlgmr.msra.gmra.mrb[12].mxu1 %vm311_vm1, %v811_v48 }
 0x4d2   : > { %1378 = vmatpush3.bf16.msra.mxu1 %v883_v2 }
 0x4fa   : > { %v1009_v49 = vpop.xlane.xlu1 %1008 }
 0x4fb   : > { %v1016_v51 = vsub.f32 %v1004_v23, %v1009_v49  ;;  %v1113_v23 = vsel %vm421_vm4, %v228_v22, 0 }
 0x4fc   : > { %v1012_v50 = vpop.xlane.xlu0 %1011 }
 0x4fd   : > { %v1017_v52 = vsub.f32 %v1005_v29, %v1012_v50  ;;  %v1019_v57 = vmul.f32 1.442695, %v1016_v51 }
 0x4fe   : > { %v1015_v53 = vpop.xlane.xlu1 %1014 }
 0x4ff   : > { %v1021_v54 = vmul.f32 1.442695, %v1017_v52  ;;  %v1018_v55 = vsub.f32 %v1006_v28, %v1015_v53 }
 0x501   : > { %1489 = vpow2.f32 %v1021_v54  ;;  %v1023_v58 = vmul.f32 1.442695, %v1018_v55 }
 0x503   : > { %1491 = vpow2.f32 %v1023_v58 }
 0x504   : > { %1493 = vpow2.f32 %v1019_v57 }
 0x50b   : > { %v1490_v59 = vpop.eup %1489 }
 0x50c   : > { %v1028_v60 = vsel %vm311_vm1, %v1490_v59, 0.0 }
 0x50d   : > { %v1492_v61 = vpop.eup %1491  ;;  %1029 = vadd.xlane.f32.xlu1 %v1028_v60 }
 0x50e   : > { %v1031_v62 = vsel %vm318_vm2, %v1492_v61, 0.0  ;;  %v1494_v63 = vpop.eup %1493 }
 0x50f   : > { %1032 = vadd.xlane.f32.xlu0 %v1031_v62  ;;  %v1025_v0 = vsel %vm311_vm1, %v1494_v63, 0.0 }
 0x513   : > { %1026 = vadd.xlane.f32.xlu0 %v1025_v0 }
 0x51e   : > { %1042 = vrot.lane.b32.xlu1 %v1560_v3, %s1520_s9 }
 0x529   : > { %1044 = vrot.lane.b32.xlu0 %v1563_v4, %s1520_s9 }
 0x59a   : > { %v1030_v5 = vpop.xlane.xlu1 %1029 }
 0x59b   : > { %1495 = vrcp.f32 %v1030_v5 }
 0x59c   : > { %v1033_v6 = vpop.xlane.xlu0 %1032 }
 0x59d   : > { %1497 = vrcp.f32 %v1033_v6 }
 0x59e   : > { %v1043_v7 = vpop.permute.xlu1 %1042 }
 0x59f   : > { %1391 = vmatprep.subr.bf16.mxu1 %v1043_v7 }
 0x5a0   : > { %v1027_v8 = vpop.xlane.xlu0 %1026 }
 0x5a1   : > { %1499 = vrcp.f32 %v1027_v8 }
 0x5a4   : > { %v1375_v3 = vpop.f32.mrb[12].mxu1  ;;  %v1045_v11 = vpop.permute.xlu0 %1044 }
 0x5a5   : > { %v860_v9 = vpop.f32.mrb[13].mxu1  ;;  %v1496_v14 = vpop.eup %1495  ;;  %v875_v15 = vpack.c.bf16 %v1375_v3, %v1375_v3  ;;  %v1054_v16 = vand.u32 %v1045_v11, %v1599_v56 }
 0x5a6   : > { %v1376_v10 = vpop.f32.mrb[14].mxu1  ;;  %v1038_v19 = vmul.f32 %v1496_v14, %v1490_v59 }
 0x5a7   : > { %v863_v12 = vpop.f32.mrb[15].mxu1  ;;  %v1498_v17 = vpop.eup %1497 }
 0x5a8   : > { %v874_v13 = vpack.c.bf16 %v863_v12, %v860_v9  ;;  %v1039_v20 = vmul.f32 %v1498_v17, %v1492_v61 }
 0x5aa   : > { %1379 = vmatprep.mubr.msk.bf16.mxu1 %vm247_vm0, %v874_v13  ;;  %v1041_v56 = vpack.c.bf16 %v1039_v20, %v1039_v20 }
 0x5ab   : > { %v1500_v4 = vpop.eup %1499  ;;  %1380 = vmatmul.mubr.msk.bf16.vlgmr.msra.gmra.mrb[4].mxu1 %vm247_vm0, %v875_v15 }
 0x5ac   : > { %1392 = vmatpush3.bf16.msra.mxu1 %v1043_v7  ;;  %v1037_v18 = vmul.f32 %v1500_v4, %v1494_v63 }
 0x5ad   : > { %1393 = vmatprep.subr.bf16.mxu1 %v1054_v16 }
 0x5ae   : > { %v1040_v21 = vpack.c.bf16 %v1038_v19, %v1037_v18 }
 0x5b0   : > { %1394 = vmatpush3.bf16.msra.mxu1 %v1054_v16  ;;  %1395 = vmatprep.mubr.msk.bf16.mxu1 %vm311_vm1, %v1040_v21 }
 0x5b1   : > { %1431 = vmatprep.subr.msk.bf16.mxu1 %vm421_vm4, %v228_v22 }
 0x5b3   : > { %1396 = vmatmul.mubr.msk.bf16.vlgmr.msra.gmra.mrb[16].mxu1 %vm311_vm1, %v1041_v56 }
 0x5b4   : > { %1400 = vmatpush3.bf16.msra.mxu1 %v1113_v23 }
 0x686   : > { %v1397_v24 = vpop.f32.mrb[16].mxu1 }
 0x687   : > { %v1090_v25 = vpop.f32.mrb[17].mxu1  ;;  %v1105_v29 = vpack.c.bf16 %v1397_v24, %v1397_v24 }
 0x688   : > { %v1398_v26 = vpop.f32.mrb[18].mxu1 }
 0x689   : > { %v1093_v27 = vpop.f32.mrb[19].mxu1 }
 0x68a   : > { %v1104_v28 = vpack.c.bf16 %v1093_v27, %v1090_v25 }
 0x68c   : > { %1401 = vmatprep.mubr.msk.bf16.mxu1 %vm247_vm0, %v1104_v28 }
 0x68d   : > { %1402 = vmatmul.mubr.msk.bf16.vlgmr.msra.gmra.mrb[4].mxu1 %vm247_vm0, %v1105_v29 }
 0x760   : > { %v1403_v36 = vpop.f32.mrb[4].mxu1 }
 0x761   : > { %v1405_v38 = vadd.f32 %v1403_v36, %v238_v33  ;;  %v1149_v39 = vpop.f32.mrb[5].mxu1 }
 0x762   : > { %v1406_v40 = vadd.f32 %v1149_v39, %v236_v35  ;;  %v1404_v41 = vpop.f32.mrb[6].mxu1 }
 0x763   : > { %1170 = vst.msk [vmem:[%s217_s23 + $0x10] sm:$0x1] %vm1169_vm5, %v1405_v38  ;;  %v1152_v42 = vpop.f32.mrb[7].mxu1 }
 0x764   : > { %1167 = vst.msk [vmem:[%s217_s23] sm:$0xff] %vm1166_vm6, %v1406_v40  ;;  %v1407_v43 = vadd.f32 %v1152_v42, %v237_v37 }
 0x766   : > { %1168 = vst.msk [vmem:[%s217_s23 + $0x8] sm:$0xff] %vm1166_vm6, %v1407_v43 }
 0x767 PF: > { %s14_s15 = sadd.s32 1, %s1507_s15  }
 0x768   : > { %p11_p4 = scmp.ge.s32.totalorder %s14_s15, 4  }
 0x76a   :  { %13 = sbr.rel (!%p11_p4) target bundleno = 1 (0x1), region = 69 }

// kernel: vit_forward.11
= control target key start
LH: loop header
LB: loop body
LE: loop exit
PB: predicated region body
PF: predicated region fallthrough
CT: control target
= control target key end

     0   :  { %vm34_vm0 = vcmask 261120   ;;  %vm47_vm1 = vcmask 254976   ;;  %v454_v36 = vmov 0.0   ;;  %vm455_vm2 = vmmov 0   ;;  %s630_s0 = inlined_call_operand.vmem [shape: f32[34,32], index: 0, kind: input, shape index: {}]   ;;  %s631_s3 = inlined_call_operand.vmem [shape: bf16[32,64], index: 3, kind: input, shape index: {}]   ;;  %s632_s1 = inlined_call_operand.vmem [shape: f32[1,32], index: 1, kind: input, shape index: {}]   ;;  %s633_s2 = inlined_call_operand.vmem [shape: f32[1,32], index: 2, kind: input, shape index: {}]   ;;  %s634_s5 = inlined_call_operand.vmem [shape: bf16[64,32], index: 5, kind: input, shape index: {}]   ;;  %s635_s4 = inlined_call_operand.vmem [shape: f32[1,64], index: 4, kind: input, shape index: {}]   ;;  %s636_s6 = inlined_call_operand.vmem [shape: f32[1,32], index: 6, kind: input, shape index: {}]   ;;  %s637_s7 = inlined_call_operand.vmem [shape: f32[34,32], index: 7, kind: output, shape index: {}]  }
   0x1   :  { %v499_v0 = vld [vmem:[%s630_s0] sm:$0xff]  ;;  %v504_v1 = vld [vmem:[%s630_s0 + $0x10] sm:$0xff]  ;;  %v509_v2 = vld [vmem:[%s630_s0 + $0x8] sm:$0xff]  ;;  %390 = vmatprep.subr.bf16.mxu0 %v454_v36  ;;  %406 = vmatprep.subr.bf16.mxu1 %v454_v36  ;;  %vm282_vm3 = vcmask 523264  }
   0x2   :  { %v35_v3 = vsel %vm34_vm0, %v499_v0, 0.0  ;;  %v41_v4 = vsel %vm34_vm0, %v504_v1, 0.0  ;;  %v518_v5 = vld [vmem:[%s630_s0 + $0x18] sm:$0xff]  ;;  %v38_v6 = vsel %vm34_vm0, %v509_v2, 0.0  ;;  %v527_v8 = vld [vmem:[%s630_s0 + $0x20] sm:$0x3]  ;;  %394 = vmatprep.mubr.msk.bf16.mxu0 %vm455_vm2, %v454_v36  ;;  %414 = vmatprep.mubr.msk.bf16.mxu1 %vm455_vm2, %v454_v36 }
   0x3   :  { %36 = vadd.xlane.f32.xlu0 %v35_v3  ;;  %42 = vadd.xlane.f32.xlu1 %v41_v4  ;;  %v44_v7 = vsel %vm34_vm0, %v518_v5, 0.0  ;;  %v48_v9 = vsel %vm47_vm1, %v527_v8, 0.0  ;;  %v428_v35 = vld [vmem:[%s631_s3] sm:$0xff]   ;;  %v429_v37 = vld [vmem:[%s631_s3 + $0x8] sm:$0xff]  }
   0x4   :  { %391 = vmatpush3.bf16.msra.mxu0 %v428_v35  ;;  %v362_v55 = vld [vmem:[%s632_s1] ss:$0 sm:$0xff] }
   0x5   :  { %392 = vmatprep.subr.bf16.mxu0 %v454_v36  ;;  %v363_v60 = vld [vmem:[%s633_s2] ss:$0 sm:$0xff] }
   0x7   :  { %39 = vadd.xlane.f32.xlu0 %v38_v6  ;;  %45 = vadd.xlane.f32.xlu1 %v44_v7 }
   0x8   :  { %393 = vmatpush3.bf16.msra.mxu0 %v429_v37 }
   0xb   :  { %49 = vadd.xlane.f32.xlu0 %v48_v9 }
  0x90   :  { %v37_v10 = vpop.xlane.xlu0 %36  ;;  %v43_v11 = vpop.xlane.xlu1 %42 }
  0x91   :  { %v52_v12 = vmul.f32 0.03125, %v37_v10  ;;  %v54_v13 = vmul.f32 0.03125, %v43_v11 }
  0x93   :  { %v57_v14 = vsub.f32 %v499_v0, %v52_v12  ;;  %v533_v15 = vsub.f32 %v504_v1, %v54_v13 }
  0x94   :  { %v40_v16 = vpop.xlane.xlu0 %39  ;;  %v46_v17 = vpop.xlane.xlu1 %45 }
  0x95   :  { %v53_v18 = vmul.f32 0.03125, %v40_v16  ;;  %v55_v19 = vmul.f32 0.03125, %v46_v17  ;;  %v62_v20 = vmul.f32 %v57_v14, %v57_v14  ;;  %v64_v21 = vmul.f32 %v533_v15, %v533_v15 }
  0x97   :  { %v58_v22 = vsub.f32 %v509_v2, %v53_v18  ;;  %v60_v23 = vsub.f32 %v518_v5, %v55_v19  ;;  %v67_v24 = vsel %vm34_vm0, %v62_v20, 0.0  ;;  %v73_v27 = vsel %vm34_vm0, %v64_v21, 0.0  ;;  %v430_v19 = vld [vmem:[%s634_s5] sm:$0xff]   ;;  %v431_v20 = vld [vmem:[%s634_s5 + $0x8] sm:$0xff]   ;;  %v432_v21 = vld [vmem:[%s634_s5 + $0x10] sm:$0xff]  }
  0x98   :  { %68 = vadd.xlane.f32.xlu1 %v67_v24  ;;  %v50_v25 = vpop.xlane.xlu0 %49  ;;  %407 = vmatpush3.bf16.msra.mxu1 %v430_v19 }
  0x99   :  { %v56_v26 = vmul.f32 0.03125, %v50_v25  ;;  %v63_v28 = vmul.f32 %v58_v22, %v58_v22  ;;  %v65_v29 = vmul.f32 %v60_v23, %v60_v23  ;;  %408 = vmatprep.subr.bf16.mxu1 %v454_v36 }
  0x9b   :  { %v542_v30 = vsub.f32 %v527_v8, %v56_v26  ;;  %v70_v31 = vsel %vm34_vm0, %v63_v28, 0.0  ;;  %v76_v32 = vsel %vm34_vm0, %v65_v29, 0.0 }
  0x9c   :  { %74 = vadd.xlane.f32.xlu1 %v73_v27  ;;  %71 = vadd.xlane.f32.xlu0 %v70_v31 }
  0x9d   :  { %v66_v33 = vmul.f32 %v542_v30, %v542_v30  ;;  %409 = vmatpush3.bf16.msra.mxu1 %v431_v20 }
  0x9e   :  { %410 = vmatprep.subr.bf16.mxu1 %v454_v36 }
  0x9f   :  { %v79_v34 = vsel %vm47_vm1, %v66_v33, 0.0 }
  0xa0   :  { %77 = vadd.xlane.f32.xlu0 %v76_v32  ;;  %80 = vadd.xlane.f32.xlu1 %v79_v34 }
  0xa1   :  { %411 = vmatpush3.bf16.msra.mxu1 %v432_v21 }
  0xa2   :  { %412 = vmatprep.subr.bf16.mxu1 %v454_v36 }
 0x125   :  { %v69_v38 = vpop.xlane.xlu1 %68 }
 0x126   :  { %v82_v39 = vmul.f32 0.03125, %v69_v38 }
 0x128   :  { %v87_v40 = vadd.f32 1e-05, %v82_v39 }
 0x129   :  { %v75_v41 = vpop.xlane.xlu1 %74  ;;  %v72_v42 = vpop.xlane.xlu0 %71 }
 0x12a   :  { %434 = vrsqrt.f32 %v87_v40  ;;  %v84_v43 = vmul.f32 0.03125, %v75_v41  ;;  %v83_v44 = vmul.f32 0.03125, %v72_v42 }
 0x12c   :  { %v88_v45 = vadd.f32 1e-05, %v83_v44  ;;  %v89_v46 = vadd.f32 1e-05, %v84_v43 }
 0x12d   :  { %v81_v47 = vpop.xlane.xlu1 %80  ;;  %v78_v48 = vpop.xlane.xlu0 %77 }
 0x12e   :  { %v85_v49 = vmul.f32 0.03125, %v78_v48  ;;  %436 = vrsqrt.f32 %v88_v45  ;;  %v86_v50 = vmul.f32 0.03125, %v81_v47 }
 0x12f   :  { %438 = vrsqrt.f32 %v89_v46 }
 0x130   :  { %v90_v51 = vadd.f32 1e-05, %v85_v49  ;;  %v91_v52 = vadd.f32 1e-05, %v86_v50 }
 0x132   :  { %440 = vrsqrt.f32 %v90_v51 }
 0x133   :  { %442 = vrsqrt.f32 %v91_v52 }
 0x134   :  { %v435_v53 = vpop.eup %434 }
 0x135   :  { %v97_v54 = vmul.f32 %v435_v53, %v57_v14 }
 0x137   :  { %v108_v58 = vmul.f32 %v362_v55, %v97_v54 }
 0x138   :  { %v437_v56 = vpop.eup %436 }
 0x139   :  { %v98_v57 = vmul.f32 %v437_v56, %v58_v22  ;;  %v439_v59 = vpop.eup %438  ;;  %v119_v4 = vadd.f32 %v363_v60, %v108_v58  ;;  %v433_v22 = vld [vmem:[%s634_s5 + $0x18] sm:$0xff]  }
 0x13a   :  { %v99_v63 = vmul.f32 %v439_v59, %v533_v15  ;;  %413 = vmatpush3.bf16.msra.mxu1 %v433_v22 }
 0x13b   :  { %v109_v61 = vmul.f32 %v362_v55, %v98_v57 }
 0x13c   :  { %v441_v62 = vpop.eup %440  ;;  %v110_v11 = vmul.f32 %v362_v55, %v99_v63 }
 0x13d   :  { %v100_v3 = vmul.f32 %v441_v62, %v60_v23  ;;  %v120_v6 = vadd.f32 %v363_v60, %v109_v61  ;;  %v443_v10 = vpop.eup %442  ;;  %v364_v23 = vld [vmem:[%s635_s4] ss:$0 sm:$0xff] }
 0x13e   :  { %v101_v12 = vmul.f32 %v443_v10, %v542_v30  ;;  %v121_v14 = vadd.f32 %v363_v60, %v110_v11  ;;  %v370_v11 = vld [vmem:[%s636_s6] ss:$0 sm:$0xff] }
 0x13f   :  { %v124_v7 = vpack.c.bf16 %v120_v6, %v119_v4  ;;  %v111_v9 = vmul.f32 %v362_v55, %v100_v3 }
 0x140   :  { %v112_v17 = vmul.f32 %v362_v55, %v101_v12 }
 0x141   :  { %395 = vmatmul.mubr.msk.bf16.vlgmr.msra.gmra.mrb[0].mxu0 %vm34_vm0, %v124_v7  ;;  %v122_v13 = vadd.f32 %v363_v60, %v111_v9 }
 0x142   :  { %398 = vmatprep.mubr.msk.bf16.mxu0 %vm455_vm2, %v454_v36  ;;  %v123_v15 = vadd.f32 %v363_v60, %v112_v17 }
 0x143   :  { %v125_v16 = vpack.c.bf16 %v122_v13, %v121_v14 }
 0x144   :  { %v126_v18 = vpack.c.bf16 %v123_v15, %v123_v15 }
 0x149   :  { %399 = vmatmul.mubr.msk.bf16.gmra.mrb[4].mxu0 %vm34_vm0, %v125_v16 }
 0x14a   :  { %402 = vmatprep.mubr.msk.bf16.mxu0 %vm455_vm2, %v454_v36 }
 0x151   :  { %403 = vmatmul.mubr.msk.bf16.gmra.mrb[8].mxu0 %vm34_vm0, %v126_v18 }
 0x214   :  { %v193_v24 = vpop.f32.mrb[0].mxu0 }
 0x215   :  { %v194_v25 = vadd.f32 %v364_v23, %v193_v24  ;;  %v396_v26 = vpop.f32.mrb[1].mxu0 }
 0x216   :  { %v196_v27 = vpop.f32.mrb[2].mxu0 }
 0x217   :  { %v220_v28 = vmul.f32 0.70710677, %v194_v25  ;;  %v197_v29 = vadd.f32 %v364_v23, %v196_v27  ;;  %v397_v30 = vpop.f32.mrb[3].mxu0  ;;  %v215_v47 = vmul.f32 0.5, %v194_v25 }
 0x219   :  { %444 = verf.f32 %v220_v28  ;;  %v221_v31 = vmul.f32 0.70710677, %v197_v29  ;;  %v216_v48 = vmul.f32 0.5, %v197_v29 }
 0x21b   :  { %446 = verf.f32 %v221_v31 }
 0x21c   :  { %v201_v32 = vpop.f32.mrb[4].mxu0 }
 0x21d   :  { %v202_v33 = vadd.f32 %v364_v23, %v201_v32  ;;  %v400_v34 = vpop.f32.mrb[5].mxu0 }
 0x21e   :  { %v204_v35 = vpop.f32.mrb[6].mxu0 }
 0x21f   :  { %v222_v37 = vmul.f32 0.70710677, %v202_v33  ;;  %v205_v38 = vadd.f32 %v364_v23, %v204_v35  ;;  %v401_v39 = vpop.f32.mrb[7].mxu0  ;;  %v217_v59 = vmul.f32 0.5, %v202_v33 }
 0x221   :  { %448 = verf.f32 %v222_v37  ;;  %v223_v40 = vmul.f32 0.70710677, %v205_v38  ;;  %v218_v60 = vmul.f32 0.5, %v205_v38 }
 0x223   :  { %v445_v41 = vpop.eup %444  ;;  %450 = verf.f32 %v223_v40 }
 0x224   :  { %v230_v42 = vadd.f32 1.0, %v445_v41  ;;  %v209_v43 = vpop.f32.mrb[8].mxu0 }
 0x225   :  { %v447_v44 = vpop.eup %446  ;;  %v210_v45 = vadd.f32 %v364_v23, %v209_v43  ;;  %v404_v46 = vpop.f32.mrb[9].mxu0 }
 0x226   :  { %v231_v49 = vadd.f32 1.0, %v447_v44  ;;  %v212_v50 = vpop.f32.mrb[10].mxu0  ;;  %v235_v53 = vmul.f32 %v230_v42, %v215_v47 }
 0x227   :  { %v224_v51 = vmul.f32 0.70710677, %v210_v45  ;;  %v405_v52 = vpop.f32.mrb[11].mxu0  ;;  %v219_v6 = vmul.f32 0.5, %v210_v45 }
 0x228   :  { %v236_v54 = vmul.f32 %v231_v49, %v216_v48 }
 0x229   :  { %452 = verf.f32 %v224_v51 }
 0x22a   :  { %v240_v55 = vpack.c.bf16 %v236_v54, %v235_v53 }
 0x22b   :  { %v449_v56 = vpop.eup %448 }
 0x22c   :  { %v232_v57 = vadd.f32 1.0, %v449_v56  ;;  %415 = vmatmul.mubr.msk.bf16.vlgmr.msra.gmra.mrb[0].mxu1 %vm282_vm3, %v240_v55 }
 0x22d   :  { %v451_v58 = vpop.eup %450  ;;  %418 = vmatprep.mubr.msk.bf16.mxu1 %vm455_vm2, %v454_v36 }
 0x22e   :  { %v233_v61 = vadd.f32 1.0, %v451_v58  ;;  %v237_v62 = vmul.f32 %v232_v57, %v217_v59 }
 0x230   :  { %v238_v63 = vmul.f32 %v233_v61, %v218_v60 }
 0x232   :  { %v241_v3 = vpack.c.bf16 %v238_v63, %v237_v62 }
 0x233   :  { %v453_v4 = vpop.eup %452 }
 0x234   :  { %v234_v7 = vadd.f32 1.0, %v453_v4  ;;  %419 = vmatmul.mubr.msk.bf16.gmra.mrb[4].mxu1 %vm282_vm3, %v241_v3 }
 0x235   :  { %422 = vmatprep.mubr.msk.bf16.mxu1 %vm455_vm2, %v454_v36 }
 0x236   :  { %v239_v9 = vmul.f32 %v234_v7, %v219_v6 }
 0x238   :  { %v242_v10 = vpack.c.bf16 %v239_v9, %v239_v9 }
 0x23c   :  { %423 = vmatmul.mubr.msk.bf16.gmra.mrb[8].mxu1 %vm282_vm3, %v242_v10 }
 0x2ff   :  { %v326_v12 = vpop.f32.mrb[0].mxu1 }
 0x300   :  { %v327_v13 = vadd.f32 %v370_v11, %v326_v12  ;;  %v416_v14 = vpop.f32.mrb[1].mxu1 }
 0x301   :  { %v329_v16 = vpop.f32.mrb[2].mxu1 }
 0x302   :  { %v348_v17 = vadd.f32 %v327_v13, %v499_v0  ;;  %v330_v15 = vadd.f32 %v370_v11, %v329_v16  ;;  %v417_v18 = vpop.f32.mrb[3].mxu1 }
 0x304   :  { %353 = vst.msk [vmem:[%s637_s7] sm:$0xff] %vm34_vm0, %v348_v17  ;;  %v349_v36 = vadd.f32 %v330_v15, %v509_v2 }
 0x306   :  { %354 = vst.msk [vmem:[%s637_s7 + $0x8] sm:$0xff] %vm34_vm0, %v349_v36 }
 0x307   :  { %v334_v19 = vpop.f32.mrb[4].mxu1 }
 0x308   :  { %v335_v20 = vadd.f32 %v370_v11, %v334_v19  ;;  %v420_v21 = vpop.f32.mrb[5].mxu1 }
 0x309   :  { %v337_v22 = vpop.f32.mrb[6].mxu1 }
 0x30a   :  { %v350_v0 = vadd.f32 %v335_v20, %v504_v1  ;;  %v338_v23 = vadd.f32 %v370_v11, %v337_v22  ;;  %v421_v24 = vpop.f32.mrb[7].mxu1 }
 0x30c   :  { %355 = vst.msk [vmem:[%s637_s7 + $0x10] sm:$0xff] %vm34_vm0, %v350_v0  ;;  %v351_v2 = vadd.f32 %v338_v23, %v518_v5 }
 0x30e   :  { %356 = vst.msk [vmem:[%s637_s7 + $0x18] sm:$0xff] %vm34_vm0, %v351_v2 }
 0x30f   :  { %v342_v25 = vpop.f32.mrb[8].mxu1 }
 0x310   :  { %v343_v26 = vadd.f32 %v370_v11, %v342_v25  ;;  %v424_v27 = vpop.f32.mrb[9].mxu1 }
 0x311   :  { %v345_v28 = vpop.f32.mrb[10].mxu1 }
 0x312   :  { %v352_v1 = vadd.f32 %v343_v26, %v527_v8  ;;  %v425_v29 = vpop.f32.mrb[11].mxu1 }
 0x314   :  { %357 = vst.msk [vmem:[%s637_s7 + $0x20] sm:$0x3] %vm47_vm1, %v352_v1 }

// kernel: vit_forward.15
= control target key start
LH: loop header
LB: loop body
LE: loop exit
PB: predicated region body
PF: predicated region fallthrough
CT: control target
= control target key end

     0   :  { %vm25_vm0 = vcmask 254976   ;;  %s249_s0 = inlined_call_operand.vmem [shape: f32[2,32], index: 0, kind: input, shape index: {}]   ;;  %s250_s1 = inlined_call_operand.vmem [shape: f32[1,32], index: 1, kind: input, shape index: {}]   ;;  %s251_s2 = inlined_call_operand.vmem [shape: f32[1,32], index: 2, kind: input, shape index: {}]   ;;  %s252_s3 = inlined_call_operand.vmem [shape: bf16[32,10], index: 3, kind: input, shape index: {}]   ;;  %s253_s4 = inlined_call_operand.vmem [shape: f32[1,10], index: 4, kind: input, shape index: {}]   ;;  %s254_s5 = inlined_call_operand.hbm [shape: f32[2,10], index: 5, kind: output, shape index: {}]  }
   0x1   :  { %v22_v0 = vld [vmem:[%s249_s0] sm:$0x3] }
   0x2   :  { %v26_v1 = vsel %vm25_vm0, %v22_v0, 0.0 }
   0x3   :  { %27 = vadd.xlane.f32.xlu0 %v26_v1 }
   0x4   :  { %10 = vsyncpa [#allocation3], 0  ;;  %v158_v7 = vld [vmem:[%s252_s3] sm:$0xff]   ;;  %v186_v8 = vmov 0.0   ;;  %v159_v9 = vld [vmem:[%s252_s3 + $0x8] sm:$0xff]   ;;  %vm187_vm1 = vmmov 0  }
   0x5   :  { %147 = vmatprep.subr.bf16.mxu0 %v186_v8  ;;  %151 = vmatprep.mubr.msk.bf16.mxu0 %vm187_vm1, %v186_v8  ;;  %v138_v14 = vld [vmem:[%s250_s1] ss:$0 sm:$0xff]  ;;  %vm78_vm2 = vcmask 261120   ;;  %s188_s28 = smov [#allocation2]   ;;  %vm122_vm3 = vcmask 74752  }
   0x6   :  { %148 = vmatpush3.bf16.msra.mxu0 %v158_v7  ;;  %v139_v16 = vld [vmem:[%s251_s2] ss:$0 sm:$0xff]  ;;  %s130_s29 = sshll.u32 %s188_s28, 4  ;;  %s131_s29 = int_to_ptr.vmem [resolvable:$true] %s130_s29 }
   0x7   :  { %149 = vmatprep.subr.bf16.mxu0 %v186_v8  ;;  %v140_v20 = vld [vmem:[%s253_s4] ss:$0 sm:$0xff]  ;;  %s162_s1 = scalar_lea.vmem %s131_s29, 32  ;;  %p167_p1 = scmp.lt.s32.totalorder %s131_s29, %s131_s29 }
   0x8   :  { %p163_p0 = scmp.ne.s32.totalorder %s131_s29, %s162_s1  ;;  %p168_p2 = scmp.lt.s32.totalorder %s162_s1, %s162_s1 }
   0xa   :  { %150 = vmatpush3.bf16.msra.mxu0 %v159_v9  ;;  %p169_p3 = por %p168_p2, %p167_p1 }
   0xc   :  { %p170_p4 = pnand %p169_p3, %p163_p0 }
  0x90   :  { %v28_v2 = vpop.xlane.xlu0 %27 }
  0x91   :  { %v30_v3 = vmul.f32 0.03125, %v28_v2 }
  0x93   :  { %v31_v4 = vsub.f32 %v22_v0, %v30_v3 }
  0x95   :  { %v32_v5 = vmul.f32 %v31_v4, %v31_v4 }
  0x97   :  { %v33_v6 = vsel %vm25_vm0, %v32_v5, 0.0 }
  0x98   :  { %34 = vadd.xlane.f32.xlu0 %v33_v6 }
 0x125   :  { %v35_v10 = vpop.xlane.xlu0 %34 }
 0x126   :  { %v36_v11 = vmul.f32 0.03125, %v35_v10 }
 0x128   :  { %v37_v12 = vadd.f32 1e-05, %v36_v11 }
 0x12a   :  { %160 = vrsqrt.f32 %v37_v12 }
 0x134   :  { %v161_v13 = vpop.eup %160 }
 0x135   :  { %v39_v15 = vmul.f32 %v161_v13, %v31_v4 }
 0x137   :  { %v46_v17 = vmul.f32 %v138_v14, %v39_v15 }
 0x139   :  { %v53_v18 = vadd.f32 %v139_v16, %v46_v17 }
 0x13b   :  { %v54_v19 = vpack.c.bf16 %v53_v18, %v53_v18 }
 0x13d   :  { %152 = vmatmul.mubr.msk.bf16.vlgmr.msra.gmra.mrb[0].mxu0 %vm78_vm2, %v54_v19 }
 0x210   :  { %v116_v21 = vpop.f32.mrb[0].mxu0 }
 0x211   :  { %v117_v22 = vadd.f32 %v140_v20, %v116_v21  ;;  %v153_v23 = vpop.f32.mrb[1].mxu0 }
 0x212   :  { %v119_v24 = vpop.f32.mrb[2].mxu0 }
 0x213   :  { %v154_v25 = vpop.f32.mrb[3].mxu0  ;;  %123 = vst.msk [vmem:[#allocation2] sm:$0x3] %vm122_vm3, %v117_v22 }
 0x214   :  { %173 = shalt.err (!%p170_p4)
}
 0x215   :  { %s174_s4 = scalar_lea.hbm %s254_s5, 32 }
 0x216   :  { %p175_p5 = scmp.ne.s32.totalorder %s254_s5, %s174_s4  ;;  %p178_p6 = scmp.lt.u32.totalorder %s174_s4, %s254_s5 }
 0x218   :  { %p180_p7 = pnand %p178_p6, %p175_p5 }
 0x21a   :  { %183 = shalt.err (!%p180_p7)
}
 0x21b   :  { %133 = dma.vmem_to_hbm [thread:$0]  %s131_s29, 32, %s254_s5, [#allocation3]  }
 0x21c   :  { %184 = dma.done.wait [#allocation3], 32  }
 0x21d   :  { %185 = vsyncadd [#allocation3], 4294967264 }
 0x21e   :  { %137 = vsyncpa [#allocation3], 1 }

</bundles_post_ra>
